<compile_context>
chip_gen: v7x
topology: tpu7x:2x2x1
jax: 0.10.0
libtpu: 0.0.40
codegen_flags: <defaults>
</compile_context>

<pallas_src>
import jax
import jax.numpy as jnp
from jax.experimental import pallas as pl
from jax.experimental.pallas import tpu as pltpu

INPUT_DIM = 784
HIDDEN_DIM = 128
OUTPUT_DIM = 10
LATENT_DIM = 20

# Lane-padded sizes (multiples of 128).
INPUT_PAD = 896          # 7 * 128
LATENT_PAD = 128
OUTPUT_PAD = 128


def _fastthinknet_kernel(
    x_ref,
    w_bnn_ref, b_bnn_ref,
    w_gp1_ref, b_gp1_ref, w_gp2_ref, b_gp2_ref,
    w_enc1_ref, b_enc1_ref,
    w_mu_ref, b_mu_ref, w_lv_ref, b_lv_ref,
    eps_ref,
    w_dec1_ref, b_dec1_ref, w_dec2_ref, b_dec2_ref,
    w_out_ref, b_out_ref,
    out_ref,
):
    f32 = jnp.float32
    bf16 = jnp.bfloat16

    def mm(a, w_ref, b_ref):
        # bf16 MXU matmul, f32 accumulation, f32 bias add.
        return (
            jnp.dot(a.astype(bf16), w_ref[...], preferred_element_type=f32)
            + b_ref[...]
        )

    x = x_ref[...]

    # bnn_layer + ReLU
    h = jnp.maximum(mm(x, w_bnn_ref, b_bnn_ref), 0.0)

    # gp_approx: Linear -> ReLU -> Linear
    g = jnp.maximum(mm(h, w_gp1_ref, b_gp1_ref), 0.0)
    g = mm(g, w_gp2_ref, b_gp2_ref)

    # encoder: Linear -> ReLU -> (split Linear: mu / logvar, lane-aligned)
    e = jnp.maximum(mm(g, w_enc1_ref, b_enc1_ref), 0.0)
    mu = mm(e, w_mu_ref, b_mu_ref)
    logvar = mm(e, w_lv_ref, b_lv_ref)

    # reparameterize (padded latent lanes: logvar=0 -> std=1, eps=0 -> z=0,
    # and w_dec1 rows >= LATENT_DIM are zero, so padding never leaks).
    std = jnp.exp(0.5 * logvar)
    z = mu + eps_ref[...] * std

    # decoder: Linear -> ReLU -> Linear
    d = jnp.maximum(mm(z, w_dec1_ref, b_dec1_ref), 0.0)
    d = mm(d, w_dec2_ref, b_dec2_ref)

    # fc_out (padded to 128 lanes; valid cols sliced outside the kernel)
    out_ref[...] = mm(d, w_out_ref, b_out_ref)


def _round_up(n, m):
    return ((n + m - 1) // m) * m


def fastthinknet_forward(x, params, eps, *, tile_m=256):
    """x: (B, 784) or (B, C, H, W) with C*H*W == 784; eps: (B, 20).

    Returns (B, 10) float32 logits.
    """
    if x.ndim == 4:
        x = x.reshape(-1, INPUT_DIM)
    elif x.ndim == 2:
        if x.shape[1] != INPUT_DIM:
            raise ValueError(f"Expected input dim {INPUT_DIM}, got {x.shape[1]}")
    else:
        raise ValueError(f"Unexpected input shape: {x.shape}")

    batch = x.shape[0]
    tm = min(tile_m, _round_up(batch, 8))       # TM=256 for large batches
    b_pad = _round_up(batch, tm)

    # Zero-pad batch rows and lane dims (outside the kernel, once per call).
    x_p = jnp.zeros((b_pad, INPUT_PAD), jnp.float32)
    x_p = x_p.at[:batch, :INPUT_DIM].set(x.astype(jnp.float32))
    eps_p = jnp.zeros((b_pad, LATENT_PAD), jnp.float32)
    eps_p = eps_p.at[:batch, :LATENT_DIM].set(eps.astype(jnp.float32))

    ordered = (
        x_p,
        params["w_bnn"], params["b_bnn"],
        params["w_gp1"], params["b_gp1"], params["w_gp2"], params["b_gp2"],
        params["w_enc1"], params["b_enc1"],
        params["w_mu"], params["b_mu"], params["w_lv"], params["b_lv"],
        eps_p,
        params["w_dec1"], params["b_dec1"], params["w_dec2"], params["b_dec2"],
        params["w_out"], params["b_out"],
    )

    def batch_spec(arr):
        return pl.BlockSpec((tm, arr.shape[1]), lambda i: (i, 0))

    def resident_spec(arr):
        # Constant block index -> weight stays VMEM-resident across the grid.
        return pl.BlockSpec(arr.shape, lambda i: (0, 0))

    in_specs = []
    for a in ordered:
        if a is x_p or a is eps_p:
            in_specs.append(batch_spec(a))
        else:
            in_specs.append(resident_spec(a))

    out_spec = pl.BlockSpec((tm, OUTPUT_PAD), lambda i: (i, 0))

    out_padded = pl.pallas_call(
        _fastthinknet_kernel,
        out_shape=jax.ShapeDtypeStruct((b_pad, OUTPUT_PAD), jnp.float32),
        grid=(pl.cdiv(b_pad, tm),),
        in_specs=in_specs,
        out_specs=out_spec,
        compiler_params=pltpu.CompilerParams(
            dimension_semantics=("parallel",)   # lets v7x shard across both TCs
        ),
    )(*ordered)

    return out_padded[:batch, :OUTPUT_DIM]


def init_params(key):
    """Deterministic synthetic parameters.

    Weights are stored as (in_features, out_features) — the transpose of the
    PyTorch nn.Linear layout — zero-padded to 128-aligned lane/sublane dims,
    and cast to bfloat16.  Biases stay float32 as (1, out_pad) rows.
    bnn_layer weights/bias mimic the PyroSample Normal(0, 1) prior, drawn once.
    """
    keys = jax.random.split(key, 16)

    def lin(kw, kb, fan_in, fan_out, pad_in, pad_out, std=None):
        if std is None:
            std = 1.0 / jnp.sqrt(jnp.float32(fan_in))
        w = jax.random.normal(kw, (fan_in, fan_out), jnp.float32) * std
        b = jax.random.normal(kb, (1, fan_out), jnp.float32) * std
        w_p = jnp.zeros((pad_in, pad_out), jnp.float32).at[:fan_in, :fan_out].set(w)
        b_p = jnp.zeros((1, pad_out), jnp.float32).at[:, :fan_out].set(b)
        return w_p.astype(jnp.bfloat16), b_p

    H = HIDDEN_DIM
    p = {}
    # bnn_layer: Normal(0, 1) prior sample (fixed), padded 784 -> 896 rows.
    p["w_bnn"], p["b_bnn"] = lin(keys[0], keys[1], INPUT_DIM, H, INPUT_PAD, H, std=1.0)
    # gp_approx
    p["w_gp1"], p["b_gp1"] = lin(keys[2], keys[3], H, H, H, H)
    p["w_gp2"], p["b_gp2"] = lin(keys[4], keys[5], H, H, H, H)
    # encoder layer 1
    p["w_enc1"], p["b_enc1"] = lin(keys[6], keys[7], H, H, H, H)
    # encoder layer 2: one draw of Linear(H, 2*latent), split into mu / logvar
    # halves (equivalent to chunk(2, dim=-1)), each lane-padded to 128.
    std_e2 = 1.0 / jnp.sqrt(jnp.float32(H))
    w_e2 = jax.random.normal(keys[8], (H, 2 * LATENT_DIM), jnp.float32) * std_e2
    b_e2 = jax.random.normal(keys[9], (1, 2 * LATENT_DIM), jnp.float32) * std_e2
    w_mu = jnp.zeros((H, LATENT_PAD), jnp.float32).at[:, :LATENT_DIM].set(
        w_e2[:, :LATENT_DIM])
    w_lv = jnp.zeros((H, LATENT_PAD), jnp.float32).at[:, :LATENT_DIM].set(
        w_e2[:, LATENT_DIM:])
    b_mu = jnp.zeros((1, LATENT_PAD), jnp.float32).at[:, :LATENT_DIM].set(
        b_e2[:, :LATENT_DIM])
    b_lv = jnp.zeros((1, LATENT_PAD), jnp.float32).at[:, :LATENT_DIM].set(
        b_e2[:, LATENT_DIM:])
    p["w_mu"], p["b_mu"] = w_mu.astype(jnp.bfloat16), b_mu
    p["w_lv"], p["b_lv"] = w_lv.astype(jnp.bfloat16), b_lv
    # decoder (w_dec1 rows >= LATENT_DIM are zero-padded so padded z lanes
    # contribute nothing).
    p["w_dec1"], p["b_dec1"] = lin(keys[10], keys[11], LATENT_DIM, H, LATENT_PAD, H)
    p["w_dec2"], p["b_dec2"] = lin(keys[12], keys[13], H, H, H, H)
    # fc_out, lane-padded 10 -> 128 output columns.
    p["w_out"], p["b_out"] = lin(keys[14], keys[15], H, OUTPUT_DIM, H, OUTPUT_PAD)
    return p


if __name__ == "__main__":
    root = jax.random.PRNGKey(0)
    k_params, k_x, k_eps = jax.random.split(root, 3)

    params = init_params(k_params)

    # Small MNIST-like NCHW input: (batch=8, C=1, H=28, W=28) -> 784 features.
    x = jax.random.normal(k_x, (8, 1, 28, 28), jnp.float32)

    # Reparameterization noise eps ~ N(0, 1), drawn deterministically outside
    # the kernel and passed in (torch.randn_like equivalent).
    eps = jax.random.normal(k_eps, (8, LATENT_DIM), jnp.float32)

    out = fastthinknet_forward(x, params, eps)
    out = jax.block_until_ready(out)
    assert out.shape == (8, OUTPUT_DIM)
    assert bool(jnp.all(jnp.isfinite(out)))
    print("KERNEL_OK")
</pallas_src>

<mosaic_0001>
module attributes {stable_mosaic.version = 11 : i64} {
  func.func @_fastthinknet_kernel(%arg0: i32, %arg1: memref<8x896xf32, #tpu.memory_space<vmem>>, %arg2: memref<896x128xbf16, #tpu.memory_space<vmem>>, %arg3: memref<1x128xf32, #tpu.memory_space<vmem>>, %arg4: memref<128x128xbf16, #tpu.memory_space<vmem>>, %arg5: memref<1x128xf32, #tpu.memory_space<vmem>>, %arg6: memref<128x128xbf16, #tpu.memory_space<vmem>>, %arg7: memref<1x128xf32, #tpu.memory_space<vmem>>, %arg8: memref<128x128xbf16, #tpu.memory_space<vmem>>, %arg9: memref<1x128xf32, #tpu.memory_space<vmem>>, %arg10: memref<128x128xbf16, #tpu.memory_space<vmem>>, %arg11: memref<1x128xf32, #tpu.memory_space<vmem>>, %arg12: memref<128x128xbf16, #tpu.memory_space<vmem>>, %arg13: memref<1x128xf32, #tpu.memory_space<vmem>>, %arg14: memref<8x128xf32, #tpu.memory_space<vmem>>, %arg15: memref<128x128xbf16, #tpu.memory_space<vmem>>, %arg16: memref<1x128xf32, #tpu.memory_space<vmem>>, %arg17: memref<128x128xbf16, #tpu.memory_space<vmem>>, %arg18: memref<1x128xf32, #tpu.memory_space<vmem>>, %arg19: memref<128x128xbf16, #tpu.memory_space<vmem>>, %arg20: memref<1x128xf32, #tpu.memory_space<vmem>>, %arg21: memref<8x128xf32, #tpu.memory_space<vmem>>) attributes {dimension_semantics = [#tpu.dimension_semantics<parallel>], iteration_bounds = array<i64: 1>, scalar_prefetch = 0 : i64, scratch_operands = 0 : i64, tpu.core_type = #tpu.core_type<tc>, window_params = [{transform_indices = @transform_0, window_bounds = array<i64: 8, 896>}, {pipeline_mode = #tpu.pipeline_mode<synchronous>, transform_indices = @transform_1, window_bounds = array<i64: 896, 128>}, {pipeline_mode = #tpu.pipeline_mode<synchronous>, transform_indices = @transform_2, window_bounds = array<i64: 1, 128>}, {pipeline_mode = #tpu.pipeline_mode<synchronous>, transform_indices = @transform_3, window_bounds = array<i64: 128, 128>}, {pipeline_mode = #tpu.pipeline_mode<synchronous>, transform_indices = @transform_4, window_bounds = array<i64: 1, 128>}, {pipeline_mode = #tpu.pipeline_mode<synchronous>, transform_indices = @transform_5, window_bounds = array<i64: 128, 128>}, {pipeline_mode = #tpu.pipeline_mode<synchronous>, transform_indices = @transform_6, window_bounds = array<i64: 1, 128>}, {pipeline_mode = #tpu.pipeline_mode<synchronous>, transform_indices = @transform_7, window_bounds = array<i64: 128, 128>}, {pipeline_mode = #tpu.pipeline_mode<synchronous>, transform_indices = @transform_8, window_bounds = array<i64: 1, 128>}, {pipeline_mode = #tpu.pipeline_mode<synchronous>, transform_indices = @transform_9, window_bounds = array<i64: 128, 128>}, {pipeline_mode = #tpu.pipeline_mode<synchronous>, transform_indices = @transform_10, window_bounds = array<i64: 1, 128>}, {pipeline_mode = #tpu.pipeline_mode<synchronous>, transform_indices = @transform_11, window_bounds = array<i64: 128, 128>}, {pipeline_mode = #tpu.pipeline_mode<synchronous>, transform_indices = @transform_12, window_bounds = array<i64: 1, 128>}, {transform_indices = @transform_13, window_bounds = array<i64: 8, 128>}, {pipeline_mode = #tpu.pipeline_mode<synchronous>, transform_indices = @transform_14, window_bounds = array<i64: 128, 128>}, {pipeline_mode = #tpu.pipeline_mode<synchronous>, transform_indices = @transform_15, window_bounds = array<i64: 1, 128>}, {pipeline_mode = #tpu.pipeline_mode<synchronous>, transform_indices = @transform_16, window_bounds = array<i64: 128, 128>}, {pipeline_mode = #tpu.pipeline_mode<synchronous>, transform_indices = @transform_17, window_bounds = array<i64: 1, 128>}, {pipeline_mode = #tpu.pipeline_mode<synchronous>, transform_indices = @transform_18, window_bounds = array<i64: 128, 128>}, {pipeline_mode = #tpu.pipeline_mode<synchronous>, transform_indices = @transform_19, window_bounds = array<i64: 1, 128>}, {transform_indices = @transform_20, window_bounds = array<i64: 8, 128>}]} {
    %c0 = arith.constant 0 : index
    %c0_0 = arith.constant 0 : index
    %0 = vector.load %arg1[%c0, %c0_0] : memref<8x896xf32, #tpu.memory_space<vmem>>, vector<8x896xf32>
    %1 = arith.truncf %0 : vector<8x896xf32> to vector<8x896xbf16>
    %c0_1 = arith.constant 0 : index
    %c0_2 = arith.constant 0 : index
    %2 = vector.load %arg2[%c0_1, %c0_2] : memref<896x128xbf16, #tpu.memory_space<vmem>>, vector<896x128xbf16>
    %cst = arith.constant dense<0.000000e+00> : vector<8x128xf32>
    %3 = tpu.matmul %1, %2, %cst {dimension_numbers = #tpu.dot_dimension_numbers<[1], [0], [0], [1], [0, 0, 1, 1], [], []>} : vector<8x896xbf16>, vector<896x128xbf16>, vector<8x128xf32> -> vector<8x128xf32>
    %c0_3 = arith.constant 0 : index
    %c0_4 = arith.constant 0 : index
    %4 = vector.load %arg3[%c0_3, %c0_4] : memref<1x128xf32, #tpu.memory_space<vmem>>, vector<1x128xf32>
    %5 = vector.broadcast %4 : vector<1x128xf32> to vector<8x128xf32>
    %6 = arith.addf %3, %5 : vector<8x128xf32>
    %cst_5 = arith.constant 0.000000e+00 : f32
    %7 = vector.broadcast %cst_5 : f32 to vector<8x128xf32>
    %8 = arith.maximumf %6, %7 : vector<8x128xf32>
    %9 = arith.truncf %8 : vector<8x128xf32> to vector<8x128xbf16>
    %c0_6 = arith.constant 0 : index
    %c0_7 = arith.constant 0 : index
    %10 = vector.load %arg4[%c0_6, %c0_7] : memref<128x128xbf16, #tpu.memory_space<vmem>>, vector<128x128xbf16>
    %cst_8 = arith.constant dense<0.000000e+00> : vector<8x128xf32>
    %11 = tpu.matmul %9, %10, %cst_8 {dimension_numbers = #tpu.dot_dimension_numbers<[1], [0], [0], [1], [0, 0, 1, 1], [], []>} : vector<8x128xbf16>, vector<128x128xbf16>, vector<8x128xf32> -> vector<8x128xf32>
    %c0_9 = arith.constant 0 : index
    %c0_10 = arith.constant 0 : index
    %12 = vector.load %arg5[%c0_9, %c0_10] : memref<1x128xf32, #tpu.memory_space<vmem>>, vector<1x128xf32>
    %13 = vector.broadcast %12 : vector<1x128xf32> to vector<8x128xf32>
    %14 = arith.addf %11, %13 : vector<8x128xf32>
    %cst_11 = arith.constant 0.000000e+00 : f32
    %15 = vector.broadcast %cst_11 : f32 to vector<8x128xf32>
    %16 = arith.maximumf %14, %15 : vector<8x128xf32>
    %17 = arith.truncf %16 : vector<8x128xf32> to vector<8x128xbf16>
    %c0_12 = arith.constant 0 : index
    %c0_13 = arith.constant 0 : index
    %18 = vector.load %arg6[%c0_12, %c0_13] : memref<128x128xbf16, #tpu.memory_space<vmem>>, vector<128x128xbf16>
    %cst_14 = arith.constant dense<0.000000e+00> : vector<8x128xf32>
    %19 = tpu.matmul %17, %18, %cst_14 {dimension_numbers = #tpu.dot_dimension_numbers<[1], [0], [0], [1], [0, 0, 1, 1], [], []>} : vector<8x128xbf16>, vector<128x128xbf16>, vector<8x128xf32> -> vector<8x128xf32>
    %c0_15 = arith.constant 0 : index
    %c0_16 = arith.constant 0 : index
    %20 = vector.load %arg7[%c0_15, %c0_16] : memref<1x128xf32, #tpu.memory_space<vmem>>, vector<1x128xf32>
    %21 = vector.broadcast %20 : vector<1x128xf32> to vector<8x128xf32>
    %22 = arith.addf %19, %21 : vector<8x128xf32>
    %23 = arith.truncf %22 : vector<8x128xf32> to vector<8x128xbf16>
    %c0_17 = arith.constant 0 : index
    %c0_18 = arith.constant 0 : index
    %24 = vector.load %arg8[%c0_17, %c0_18] : memref<128x128xbf16, #tpu.memory_space<vmem>>, vector<128x128xbf16>
    %cst_19 = arith.constant dense<0.000000e+00> : vector<8x128xf32>
    %25 = tpu.matmul %23, %24, %cst_19 {dimension_numbers = #tpu.dot_dimension_numbers<[1], [0], [0], [1], [0, 0, 1, 1], [], []>} : vector<8x128xbf16>, vector<128x128xbf16>, vector<8x128xf32> -> vector<8x128xf32>
    %c0_20 = arith.constant 0 : index
    %c0_21 = arith.constant 0 : index
    %26 = vector.load %arg9[%c0_20, %c0_21] : memref<1x128xf32, #tpu.memory_space<vmem>>, vector<1x128xf32>
    %27 = vector.broadcast %26 : vector<1x128xf32> to vector<8x128xf32>
    %28 = arith.addf %25, %27 : vector<8x128xf32>
    %cst_22 = arith.constant 0.000000e+00 : f32
    %29 = vector.broadcast %cst_22 : f32 to vector<8x128xf32>
    %30 = arith.maximumf %28, %29 : vector<8x128xf32>
    %31 = arith.truncf %30 : vector<8x128xf32> to vector<8x128xbf16>
    %c0_23 = arith.constant 0 : index
    %c0_24 = arith.constant 0 : index
    %32 = vector.load %arg10[%c0_23, %c0_24] : memref<128x128xbf16, #tpu.memory_space<vmem>>, vector<128x128xbf16>
    %cst_25 = arith.constant dense<0.000000e+00> : vector<8x128xf32>
    %33 = tpu.matmul %31, %32, %cst_25 {dimension_numbers = #tpu.dot_dimension_numbers<[1], [0], [0], [1], [0, 0, 1, 1], [], []>} : vector<8x128xbf16>, vector<128x128xbf16>, vector<8x128xf32> -> vector<8x128xf32>
    %c0_26 = arith.constant 0 : index
    %c0_27 = arith.constant 0 : index
    %34 = vector.load %arg11[%c0_26, %c0_27] : memref<1x128xf32, #tpu.memory_space<vmem>>, vector<1x128xf32>
    %35 = vector.broadcast %34 : vector<1x128xf32> to vector<8x128xf32>
    %36 = arith.addf %33, %35 : vector<8x128xf32>
    %37 = arith.truncf %30 : vector<8x128xf32> to vector<8x128xbf16>
    %c0_28 = arith.constant 0 : index
    %c0_29 = arith.constant 0 : index
    %38 = vector.load %arg12[%c0_28, %c0_29] : memref<128x128xbf16, #tpu.memory_space<vmem>>, vector<128x128xbf16>
    %cst_30 = arith.constant dense<0.000000e+00> : vector<8x128xf32>
    %39 = tpu.matmul %37, %38, %cst_30 {dimension_numbers = #tpu.dot_dimension_numbers<[1], [0], [0], [1], [0, 0, 1, 1], [], []>} : vector<8x128xbf16>, vector<128x128xbf16>, vector<8x128xf32> -> vector<8x128xf32>
    %c0_31 = arith.constant 0 : index
    %c0_32 = arith.constant 0 : index
    %40 = vector.load %arg13[%c0_31, %c0_32] : memref<1x128xf32, #tpu.memory_space<vmem>>, vector<1x128xf32>
    %41 = vector.broadcast %40 : vector<1x128xf32> to vector<8x128xf32>
    %42 = arith.addf %39, %41 : vector<8x128xf32>
    %cst_33 = arith.constant 5.000000e-01 : f32
    %43 = vector.broadcast %cst_33 : f32 to vector<8x128xf32>
    %44 = arith.mulf %43, %42 : vector<8x128xf32>
    %45 = math.exp %44 : vector<8x128xf32>
    %c0_34 = arith.constant 0 : index
    %c0_35 = arith.constant 0 : index
    %46 = vector.load %arg14[%c0_34, %c0_35] : memref<8x128xf32, #tpu.memory_space<vmem>>, vector<8x128xf32>
    %47 = arith.mulf %46, %45 : vector<8x128xf32>
    %48 = arith.addf %36, %47 : vector<8x128xf32>
    %49 = arith.truncf %48 : vector<8x128xf32> to vector<8x128xbf16>
    %c0_36 = arith.constant 0 : index
    %c0_37 = arith.constant 0 : index
    %50 = vector.load %arg15[%c0_36, %c0_37] : memref<128x128xbf16, #tpu.memory_space<vmem>>, vector<128x128xbf16>
    %cst_38 = arith.constant dense<0.000000e+00> : vector<8x128xf32>
    %51 = tpu.matmul %49, %50, %cst_38 {dimension_numbers = #tpu.dot_dimension_numbers<[1], [0], [0], [1], [0, 0, 1, 1], [], []>} : vector<8x128xbf16>, vector<128x128xbf16>, vector<8x128xf32> -> vector<8x128xf32>
    %c0_39 = arith.constant 0 : index
    %c0_40 = arith.constant 0 : index
    %52 = vector.load %arg16[%c0_39, %c0_40] : memref<1x128xf32, #tpu.memory_space<vmem>>, vector<1x128xf32>
    %53 = vector.broadcast %52 : vector<1x128xf32> to vector<8x128xf32>
    %54 = arith.addf %51, %53 : vector<8x128xf32>
    %cst_41 = arith.constant 0.000000e+00 : f32
    %55 = vector.broadcast %cst_41 : f32 to vector<8x128xf32>
    %56 = arith.maximumf %54, %55 : vector<8x128xf32>
    %57 = arith.truncf %56 : vector<8x128xf32> to vector<8x128xbf16>
    %c0_42 = arith.constant 0 : index
    %c0_43 = arith.constant 0 : index
    %58 = vector.load %arg17[%c0_42, %c0_43] : memref<128x128xbf16, #tpu.memory_space<vmem>>, vector<128x128xbf16>
    %cst_44 = arith.constant dense<0.000000e+00> : vector<8x128xf32>
    %59 = tpu.matmul %57, %58, %cst_44 {dimension_numbers = #tpu.dot_dimension_numbers<[1], [0], [0], [1], [0, 0, 1, 1], [], []>} : vector<8x128xbf16>, vector<128x128xbf16>, vector<8x128xf32> -> vector<8x128xf32>
    %c0_45 = arith.constant 0 : index
    %c0_46 = arith.constant 0 : index
    %60 = vector.load %arg18[%c0_45, %c0_46] : memref<1x128xf32, #tpu.memory_space<vmem>>, vector<1x128xf32>
    %61 = vector.broadcast %60 : vector<1x128xf32> to vector<8x128xf32>
    %62 = arith.addf %59, %61 : vector<8x128xf32>
    %63 = arith.truncf %62 : vector<8x128xf32> to vector<8x128xbf16>
    %c0_47 = arith.constant 0 : index
    %c0_48 = arith.constant 0 : index
    %64 = vector.load %arg19[%c0_47, %c0_48] : memref<128x128xbf16, #tpu.memory_space<vmem>>, vector<128x128xbf16>
    %cst_49 = arith.constant dense<0.000000e+00> : vector<8x128xf32>
    %65 = tpu.matmul %63, %64, %cst_49 {dimension_numbers = #tpu.dot_dimension_numbers<[1], [0], [0], [1], [0, 0, 1, 1], [], []>} : vector<8x128xbf16>, vector<128x128xbf16>, vector<8x128xf32> -> vector<8x128xf32>
    %c0_50 = arith.constant 0 : index
    %c0_51 = arith.constant 0 : index
    %66 = vector.load %arg20[%c0_50, %c0_51] : memref<1x128xf32, #tpu.memory_space<vmem>>, vector<1x128xf32>
    %67 = vector.broadcast %66 : vector<1x128xf32> to vector<8x128xf32>
    %68 = arith.addf %65, %67 : vector<8x128xf32>
    %c0_52 = arith.constant 0 : index
    %c0_53 = arith.constant 0 : index
    %69 = vector.load %arg21[%c0_52, %c0_53] : memref<8x128xf32, #tpu.memory_space<vmem>>, vector<8x128xf32>
    tpu.vector_store %arg21[%c0_52, %c0_53], %68 {strides = array<i32>} : memref<8x128xf32, #tpu.memory_space<vmem>>, vector<8x128xf32>,
    return
  }
  func.func @transform_0(%arg0: i32) -> (i32, i32) {
    %c0_i32 = arith.constant 0 : i32
    %c0_i32_0 = arith.constant 0 : i32
    return %arg0, %c0_i32 : i32, i32
  }
  func.func @transform_1(%arg0: i32) -> (i32, i32) {
    %c0_i32 = arith.constant 0 : i32
    %c0_i32_0 = arith.constant 0 : i32
    %c0_i32_1 = arith.constant 0 : i32
    return %c0_i32, %c0_i32_0 : i32, i32
  }
  func.func @transform_2(%arg0: i32) -> (i32, i32) {
    %c0_i32 = arith.constant 0 : i32
    %c0_i32_0 = arith.constant 0 : i32
    %c0_i32_1 = arith.constant 0 : i32
    return %c0_i32, %c0_i32_0 : i32, i32
  }
  func.func @transform_3(%arg0: i32) -> (i32, i32) {
    %c0_i32 = arith.constant 0 : i32
    %c0_i32_0 = arith.constant 0 : i32
    %c0_i32_1 = arith.constant 0 : i32
    return %c0_i32, %c0_i32_0 : i32, i32
  }
  func.func @transform_4(%arg0: i32) -> (i32, i32) {
    %c0_i32 = arith.constant 0 : i32
    %c0_i32_0 = arith.constant 0 : i32
    %c0_i32_1 = arith.constant 0 : i32
    return %c0_i32, %c0_i32_0 : i32, i32
  }
  func.func @transform_5(%arg0: i32) -> (i32, i32) {
    %c0_i32 = arith.constant 0 : i32
    %c0_i32_0 = arith.constant 0 : i32
    %c0_i32_1 = arith.constant 0 : i32
    return %c0_i32, %c0_i32_0 : i32, i32
  }
  func.func @transform_6(%arg0: i32) -> (i32, i32) {
    %c0_i32 = arith.constant 0 : i32
    %c0_i32_0 = arith.constant 0 : i32
    %c0_i32_1 = arith.constant 0 : i32
    return %c0_i32, %c0_i32_0 : i32, i32
  }
  func.func @transform_7(%arg0: i32) -> (i32, i32) {
    %c0_i32 = arith.constant 0 : i32
    %c0_i32_0 = arith.constant 0 : i32
    %c0_i32_1 = arith.constant 0 : i32
    return %c0_i32, %c0_i32_0 : i32, i32
  }
  func.func @transform_8(%arg0: i32) -> (i32, i32) {
    %c0_i32 = arith.constant 0 : i32
    %c0_i32_0 = arith.constant 0 : i32
    %c0_i32_1 = arith.constant 0 : i32
    return %c0_i32, %c0_i32_0 : i32, i32
  }
  func.func @transform_9(%arg0: i32) -> (i32, i32) {
    %c0_i32 = arith.constant 0 : i32
    %c0_i32_0 = arith.constant 0 : i32
    %c0_i32_1 = arith.constant 0 : i32
    return %c0_i32, %c0_i32_0 : i32, i32
  }
  func.func @transform_10(%arg0: i32) -> (i32, i32) {
    %c0_i32 = arith.constant 0 : i32
    %c0_i32_0 = arith.constant 0 : i32
    %c0_i32_1 = arith.constant 0 : i32
    return %c0_i32, %c0_i32_0 : i32, i32
  }
  func.func @transform_11(%arg0: i32) -> (i32, i32) {
    %c0_i32 = arith.constant 0 : i32
    %c0_i32_0 = arith.constant 0 : i32
    %c0_i32_1 = arith.constant 0 : i32
    return %c0_i32, %c0_i32_0 : i32, i32
  }
  func.func @transform_12(%arg0: i32) -> (i32, i32) {
    %c0_i32 = arith.constant 0 : i32
    %c0_i32_0 = arith.constant 0 : i32
    %c0_i32_1 = arith.constant 0 : i32
    return %c0_i32, %c0_i32_0 : i32, i32
  }
  func.func @transform_13(%arg0: i32) -> (i32, i32) {
    %c0_i32 = arith.constant 0 : i32
    %c0_i32_0 = arith.constant 0 : i32
    return %arg0, %c0_i32 : i32, i32
  }
  func.func @transform_14(%arg0: i32) -> (i32, i32) {
    %c0_i32 = arith.constant 0 : i32
    %c0_i32_0 = arith.constant 0 : i32
    %c0_i32_1 = arith.constant 0 : i32
    return %c0_i32, %c0_i32_0 : i32, i32
  }
  func.func @transform_15(%arg0: i32) -> (i32, i32) {
    %c0_i32 = arith.constant 0 : i32
    %c0_i32_0 = arith.constant 0 : i32
    %c0_i32_1 = arith.constant 0 : i32
    return %c0_i32, %c0_i32_0 : i32, i32
  }
  func.func @transform_16(%arg0: i32) -> (i32, i32) {
    %c0_i32 = arith.constant 0 : i32
    %c0_i32_0 = arith.constant 0 : i32
    %c0_i32_1 = arith.constant 0 : i32
    return %c0_i32, %c0_i32_0 : i32, i32
  }
  func.func @transform_17(%arg0: i32) -> (i32, i32) {
    %c0_i32 = arith.constant 0 : i32
    %c0_i32_0 = arith.constant 0 : i32
    %c0_i32_1 = arith.constant 0 : i32
    return %c0_i32, %c0_i32_0 : i32, i32
  }
  func.func @transform_18(%arg0: i32) -> (i32, i32) {
    %c0_i32 = arith.constant 0 : i32
    %c0_i32_0 = arith.constant 0 : i32
    %c0_i32_1 = arith.constant 0 : i32
    return %c0_i32, %c0_i32_0 : i32, i32
  }
  func.func @transform_19(%arg0: i32) -> (i32, i32) {
    %c0_i32 = arith.constant 0 : i32
    %c0_i32_0 = arith.constant 0 : i32
    %c0_i32_1 = arith.constant 0 : i32
    return %c0_i32, %c0_i32_0 : i32, i32
  }
  func.func @transform_20(%arg0: i32) -> (i32, i32) {
    %c0_i32 = arith.constant 0 : i32
    %c0_i32_0 = arith.constant 0 : i32
    return %arg0, %c0_i32 : i32, i32
  }
}

</mosaic_0001>

<bundles_post_ra>
// kernel: tpu_custom_call.1
= control target key start
LH: loop header
LB: loop body
LE: loop exit
PB: predicated region body
PF: predicated region fallthrough
CT: control target
= control target key end

     0   :  { %s3204_s0 = inlined_call_operand.hbm [shape: f32[8,896], index: 0, kind: input, shape index: {}]   ;;  %s3205_s1 = inlined_call_operand.hbm [shape: bf16[896,128], index: 1, kind: input, shape index: {}]   ;;  %s3206_s2 = inlined_call_operand.vmem [shape: f32[1,128], index: 2, kind: input, shape index: {}]   ;;  %s3207_s3 = inlined_call_operand.hbm [shape: bf16[128,128], index: 3, kind: input, shape index: {}]   ;;  %s3208_s4 = inlined_call_operand.vmem [shape: f32[1,128], index: 4, kind: input, shape index: {}]   ;;  %s3209_s5 = inlined_call_operand.hbm [shape: bf16[128,128], index: 5, kind: input, shape index: {}]   ;;  %s3210_s6 = inlined_call_operand.vmem [shape: f32[1,128], index: 6, kind: input, shape index: {}]   ;;  %s3211_s7 = inlined_call_operand.hbm [shape: bf16[128,128], index: 7, kind: input, shape index: {}]   ;;  %s3212_s8 = inlined_call_operand.vmem [shape: f32[1,128], index: 8, kind: input, shape index: {}]   ;;  %s3213_s9 = inlined_call_operand.hbm [shape: bf16[128,128], index: 9, kind: input, shape index: {}]   ;;  %s3214_s10 = inlined_call_operand.hbm [shape: f32[1,128], index: 10, kind: input, shape index: {}]   ;;  %s3215_s11 = inlined_call_operand.hbm [shape: bf16[128,128], index: 11, kind: input, shape index: {}]   ;;  %s3216_s12 = inlined_call_operand.hbm [shape: f32[1,128], index: 12, kind: input, shape index: {}]   ;;  %s3217_s13 = inlined_call_operand.hbm [shape: f32[8,128], index: 13, kind: input, shape index: {}]   ;;  %s3218_s14 = inlined_call_operand.hbm [shape: bf16[128,128], index: 14, kind: input, shape index: {}]   ;;  %s3219_s15 = inlined_call_operand.hbm [shape: f32[1,128], index: 15, kind: input, shape index: {}]   ;;  %s3220_s16 = inlined_call_operand.hbm [shape: bf16[128,128], index: 16, kind: input, shape index: {}]   ;;  %s3221_s17 = inlined_call_operand.hbm [shape: f32[1,128], index: 17, kind: input, shape index: {}]   ;;  %s3222_s18 = inlined_call_operand.vmem [shape: bf16[128,128], index: 18, kind: input, shape index: {}]   ;;  %s3223_s19 = inlined_call_operand.vmem [shape: f32[1,128], index: 19, kind: input, shape index: {}]   ;;  %s3224_s20 = inlined_call_operand.hbm [shape: f32[8,128], index: 20, kind: output, shape index: {}]  }
   0x1   :  { %3229 = sst [smem:[#allocation35_spill]] %s3204_s0 }
   0x2   :  { %3230 = sst [smem:[#allocation36_spill]] %s3205_s1 }
   0x3   :  { %3231 = sst [smem:[#allocation37_spill]] %s3206_s2 }
   0x4   :  { %3232 = sst [smem:[#allocation38_spill]] %s3207_s3 }
   0x5   :  { %3233 = sst [smem:[#allocation39_spill]] %s3208_s4 }
   0x6   :  { %3234 = sst [smem:[#allocation40_spill]] %s3223_s19 }
   0x7   :  { %3235 = sst [smem:[#allocation41_spill]] %s3224_s20 }
   0x8   :  { %25 = vsyncpa [#allocation3], 0 }
   0x9   :  { %26 = vsyncpa [#allocation6], 0 }
   0xa   :  { %27 = vsyncpa [#allocation9], 0 }
   0xb   :  { %28 = vsyncpa [#allocation12], 0 }
   0xc   :  { %29 = vsyncpa [#allocation15], 0 }
   0xd   :  { %30 = vsyncpa [#allocation18], 0 }
   0xe   :  { %31 = vsyncpa [#allocation21], 0 }
   0xf   :  { %32 = vsyncpa [#allocation24], 0 }
  0x10   :  { %33 = vsyncpa [#allocation4], 0  ;;  %s2747_s1 = smov [#allocation5]   ;;  %s3236_s2 = sld [smem:[#allocation36_spill]] }
  0x11   :  { %s49_s22 = sshll.u32 %s2747_s1, 4  ;;  %s50_s22 = int_to_ptr.vmem [resolvable:$true] %s49_s22 }
  0x16   :  { %s2399_s25 = scalar_lea.hbm %s3236_s2, 7168 }
  0x17   :  { %p2400_p0 = scmp.ne.s32.totalorder %s3236_s2, %s2399_s25  ;;  %p2403_p1 = scmp.lt.u32.totalorder %s2399_s25, %s3236_s2 }
  0x19   :  { %p2405_p2 = pnand %p2403_p1, %p2400_p0 }
  0x1b   :  { %2408 = shalt.err (!%p2405_p2)
}
  0x1c   :  { %s2409_s4 = scalar_lea.vmem %s50_s22, 7168  ;;  %p2414_p4 = scmp.lt.s32.totalorder %s50_s22, %s50_s22 }
  0x1d   :  { %p2410_p3 = scmp.ne.s32.totalorder %s50_s22, %s2409_s4  ;;  %p2415_p5 = scmp.lt.s32.totalorder %s2409_s4, %s2409_s4 }
  0x1f   :  { %p2416_p6 = por %p2415_p5, %p2414_p4 }
  0x21   :  { %p2417_p7 = pnand %p2416_p6, %p2410_p3 }
  0x23   :  { %2420 = shalt.err (!%p2417_p7)
}
  0x24   :  { %s2748_s29 = smov 64   ;;  %s2749_s30 = smov 4  }
  0x25   :  { %55 = dma.hbm_to_vmem [thread:$0]  %s3236_s2, 7168, %s50_s22, [#allocation6], %s2748_s29, %s2748_s29, %s2749_s30  }
  0x26   :  { %s2750_s1 = smov [#allocation8]   ;;  %s2751_s24 = smov [#allocation11]  }
  0x27   :  { %s77_s23 = sshll.u32 %s2750_s1, 4  ;;  %s105_s25 = sshll.u32 %s2751_s24, 4  ;;  %s78_s23 = int_to_ptr.vmem [resolvable:$true] %s77_s23  ;;  %s106_s25 = int_to_ptr.vmem [resolvable:$true] %s105_s25 }
  0x28   :  { %s2421_s27 = scalar_lea.hbm %s3209_s5, 1024 }
  0x29   :  { %p2422_p8 = scmp.ne.s32.totalorder %s3209_s5, %s2421_s27  ;;  %p2425_p9 = scmp.lt.u32.totalorder %s2421_s27, %s3209_s5 }
  0x2b   :  { %p2427_p10 = pnand %p2425_p9, %p2422_p8 }
  0x2d   :  { %2430 = shalt.err (!%p2427_p10)
}
  0x2e   :  { %s2431_s22 = scalar_lea.vmem %s78_s23, 1024  ;;  %p2436_p12 = scmp.lt.s32.totalorder %s78_s23, %s78_s23 }
  0x2f   :  { %p2432_p11 = scmp.ne.s32.totalorder %s78_s23, %s2431_s22  ;;  %p2437_p13 = scmp.lt.s32.totalorder %s2431_s22, %s2431_s22 }
  0x31   :  { %p2438_p0 = por %p2437_p13, %p2436_p12 }
  0x33   :  { %p2439_p1 = pnand %p2438_p0, %p2432_p11 }
  0x35   :  { %2442 = shalt.err (!%p2439_p1)
}
  0x36   :  { %83 = dma.hbm_to_vmem [thread:$0]  %s3209_s5, 1024, %s78_s23, [#allocation9], %s2748_s29, %s2748_s29, %s2749_s30  }
  0x37   :  { %s2443_s20 = scalar_lea.hbm %s3213_s9, 1024 }
  0x38   :  { %p2444_p2 = scmp.ne.s32.totalorder %s3213_s9, %s2443_s20  ;;  %p2447_p3 = scmp.lt.u32.totalorder %s2443_s20, %s3213_s9 }
  0x3a   :  { %p2449_p4 = pnand %p2447_p3, %p2444_p2 }
  0x3c   :  { %2452 = shalt.err (!%p2449_p4)
}
  0x3d   :  { %s2453_s27 = scalar_lea.vmem %s106_s25, 1024  ;;  %p2458_p6 = scmp.lt.s32.totalorder %s106_s25, %s106_s25 }
  0x3e   :  { %p2454_p5 = scmp.ne.s32.totalorder %s106_s25, %s2453_s27  ;;  %p2459_p7 = scmp.lt.s32.totalorder %s2453_s27, %s2453_s27 }
  0x40   :  { %p2460_p8 = por %p2459_p7, %p2458_p6 }
  0x42   :  { %p2461_p9 = pnand %p2460_p8, %p2454_p5 }
  0x44   :  { %2464 = shalt.err (!%p2461_p9)
}
  0x45   :  { %111 = dma.hbm_to_vmem [thread:$0]  %s3213_s9, 1024, %s106_s25, [#allocation12], %s2748_s29, %s2748_s29, %s2749_s30  }
  0x46   :  { %s2752_s28 = smov [#allocation14]   ;;  %s2753_s22 = smov [#allocation17]  }
  0x47   :  { %s127_s4 = sshll.u32 %s2752_s28, 4  ;;  %s150_s2 = sshll.u32 %s2753_s22, 4  ;;  %s128_s4 = int_to_ptr.vmem [resolvable:$true] %s127_s4  ;;  %s151_s2 = int_to_ptr.vmem [resolvable:$true] %s150_s2 }
  0x48   :  { %s2465_s19 = scalar_lea.hbm %s3215_s11, 1024 }
  0x49   :  { %p2466_p10 = scmp.ne.s32.totalorder %s3215_s11, %s2465_s19  ;;  %p2469_p11 = scmp.lt.u32.totalorder %s2465_s19, %s3215_s11 }
  0x4b   :  { %p2471_p12 = pnand %p2469_p11, %p2466_p10 }
  0x4d   :  { %2474 = shalt.err (!%p2471_p12)
}
  0x4e   :  { %s2475_s9 = scalar_lea.vmem %s128_s4, 1024  ;;  %p2480_p0 = scmp.lt.s32.totalorder %s128_s4, %s128_s4 }
  0x4f   :  { %p2476_p13 = scmp.ne.s32.totalorder %s128_s4, %s2475_s9  ;;  %p2481_p1 = scmp.lt.s32.totalorder %s2475_s9, %s2475_s9 }
  0x51   :  { %p2482_p2 = por %p2481_p1, %p2480_p0 }
  0x53   :  { %p2483_p3 = pnand %p2482_p2, %p2476_p13 }
  0x55   :  { %2486 = shalt.err (!%p2483_p3)
}
  0x56   :  { %133 = dma.hbm_to_vmem [thread:$0]  %s3215_s11, 1024, %s128_s4, [#allocation15], %s2748_s29, %s2748_s29, %s2749_s30  }
  0x57   :  { %s2487_s23 = scalar_lea.hbm %s3217_s13, 128 }
  0x58   :  { %p2488_p4 = scmp.ne.s32.totalorder %s3217_s13, %s2487_s23  ;;  %p2491_p5 = scmp.lt.u32.totalorder %s2487_s23, %s3217_s13 }
  0x5a   :  { %p2493_p6 = pnand %p2491_p5, %p2488_p4 }
  0x5c   :  { %2496 = shalt.err (!%p2493_p6)
}
  0x5d   :  { %s2497_s19 = scalar_lea.vmem %s151_s2, 128  ;;  %p2502_p8 = scmp.lt.s32.totalorder %s151_s2, %s151_s2 }
  0x5e   :  { %p2498_p7 = scmp.ne.s32.totalorder %s151_s2, %s2497_s19  ;;  %p2503_p9 = scmp.lt.s32.totalorder %s2497_s19, %s2497_s19 }
  0x60   :  { %p2504_p10 = por %p2503_p9, %p2502_p8 }
  0x62   :  { %p2505_p11 = pnand %p2504_p10, %p2498_p7 }
  0x64   :  { %2508 = shalt.err (!%p2505_p11)
}
  0x65   :  { %153 = dma.hbm_to_vmem [thread:$0]  %s3217_s13, 128, %s151_s2, [#allocation18]  }
  0x66   :  { %s2754_s20 = smov [#allocation20]   ;;  %s2755_s24 = smov [#allocation2]  }
  0x67   :  { %s172_s1 = sshll.u32 %s2754_s20, 4  ;;  %s40_s3 = sshll.u32 %s2755_s24, 4  ;;  %s173_s1 = int_to_ptr.vmem [resolvable:$true] %s172_s1  ;;  %s41_s3 = int_to_ptr.vmem [resolvable:$true] %s40_s3 }
  0x68   :  { %s2509_s26 = scalar_lea.hbm %s3219_s15, 16 }
  0x69   :  { %p2510_p12 = scmp.ne.s32.totalorder %s3219_s15, %s2509_s26  ;;  %p2513_p13 = scmp.lt.u32.totalorder %s2509_s26, %s3219_s15 }
  0x6b   :  { %p2515_p0 = pnand %p2513_p13, %p2510_p12 }
  0x6d   :  { %2518 = shalt.err (!%p2515_p0)
}
  0x6e   :  { %s2519_s13 = scalar_lea.vmem %s173_s1, 16  ;;  %s2523_s2 = scalar_lea.vmem %s173_s1, 32 }
  0x6f   :  { %p2520_p1 = scmp.ne.s32.totalorder %s173_s1, %s2519_s13  ;;  %p2524_p2 = scmp.lt.s32.totalorder %s173_s1, %s173_s1 }
  0x70   :  { %p2525_p3 = scmp.lt.s32.totalorder %s2523_s2, %s2519_s13 }
  0x72   :  { %p2526_p4 = por %p2525_p3, %p2524_p2 }
  0x74   :  { %p2527_p5 = pnand %p2526_p4, %p2520_p1 }
  0x76   :  { %2530 = shalt.err (!%p2527_p5)
}
  0x77   :  { %175 = dma.hbm_to_vmem [thread:$0]  %s3219_s15, 16, %s173_s1, [#allocation21]  }
  0x78   :  { %s3237_s11 = sld [smem:[#allocation35_spill]] }
  0x7e   :  { %s2531_s4 = scalar_lea.hbm %s3237_s11, 896 }
  0x7f   :  { %p2532_p6 = scmp.ne.s32.totalorder %s3237_s11, %s2531_s4  ;;  %p2535_p7 = scmp.lt.u32.totalorder %s2531_s4, %s3237_s11 }
  0x81   :  { %p2537_p8 = pnand %p2535_p7, %p2532_p6 }
  0x83   :  { %2540 = shalt.err (!%p2537_p8)
}
  0x84   :  { %s2541_s26 = scalar_lea.vmem %s41_s3, 896  ;;  %p2546_p10 = scmp.lt.s32.totalorder %s41_s3, %s41_s3 }
  0x85   :  { %p2542_p9 = scmp.ne.s32.totalorder %s41_s3, %s2541_s26  ;;  %p2547_p11 = scmp.lt.s32.totalorder %s2541_s26, %s2541_s26 }
  0x87   :  { %p2548_p12 = por %p2547_p11, %p2546_p10 }
  0x89   :  { %p2549_p13 = pnand %p2548_p12, %p2542_p9 }
  0x8b   :  { %2552 = shalt.err (!%p2549_p13)
}
  0x8c   :  { %43 = dma.hbm_to_vmem [thread:$0]  %s3237_s11, 896, %s41_s3, [#allocation3]  }
  0x8d   :  { %s2756_s27 = smov [#allocation7]   ;;  %s2757_s23 = smov [#allocation10]  }
  0x8e   :  { %s63_s5 = sshll.u32 %s2756_s27, 4  ;;  %s91_s28 = sshll.u32 %s2757_s23, 4  ;;  %s64_s5 = int_to_ptr.vmem [resolvable:$true] %s63_s5  ;;  %s92_s28 = int_to_ptr.vmem [resolvable:$true] %s91_s28 }
  0x8f   :  { %s3238_s22 = sld [smem:[#allocation38_spill]] }
  0x95   :  { %s2553_s0 = scalar_lea.hbm %s3238_s22, 1024 }
  0x96   :  { %p2554_p0 = scmp.ne.s32.totalorder %s3238_s22, %s2553_s0  ;;  %p2557_p1 = scmp.lt.u32.totalorder %s2553_s0, %s3238_s22 }
  0x98   :  { %p2559_p2 = pnand %p2557_p1, %p2554_p0 }
  0x9a   :  { %2562 = shalt.err (!%p2559_p2)
}
  0x9b   :  { %s2563_s3 = scalar_lea.vmem %s64_s5, 1024  ;;  %p2568_p4 = scmp.lt.s32.totalorder %s64_s5, %s64_s5 }
  0x9c   :  { %p2564_p3 = scmp.ne.s32.totalorder %s64_s5, %s2563_s3  ;;  %p2569_p5 = scmp.lt.s32.totalorder %s2563_s3, %s2563_s3 }
  0x9e   :  { %p2570_p6 = por %p2569_p5, %p2568_p4 }
  0xa0   :  { %p2571_p7 = pnand %p2570_p6, %p2564_p3 }
  0xa2   :  { %2574 = shalt.err (!%p2571_p7)
}
  0xa3   :  { %69 = dma.hbm_to_vmem [thread:$0]  %s3238_s22, 1024, %s64_s5, [#allocation6], %s2748_s29, %s2748_s29, %s2749_s30  }
  0xa4   :  { %s2575_s26 = scalar_lea.hbm %s3211_s7, 1024 }
  0xa5   :  { %p2576_p8 = scmp.ne.s32.totalorder %s3211_s7, %s2575_s26  ;;  %p2579_p9 = scmp.lt.u32.totalorder %s2575_s26, %s3211_s7 }
  0xa7   :  { %p2581_p10 = pnand %p2579_p9, %p2576_p8 }
  0xa9   :  { %2584 = shalt.err (!%p2581_p10)
}
  0xaa   :  { %s2585_s13 = scalar_lea.vmem %s92_s28, 1024  ;;  %p2590_p12 = scmp.lt.s32.totalorder %s92_s28, %s92_s28 }
  0xab   :  { %p2586_p11 = scmp.ne.s32.totalorder %s92_s28, %s2585_s13  ;;  %p2591_p13 = scmp.lt.s32.totalorder %s2585_s13, %s2585_s13 }
  0xad   :  { %p2592_p0 = por %p2591_p13, %p2590_p12 }
  0xaf   :  { %p2593_p1 = pnand %p2592_p0, %p2586_p11 }
  0xb1   :  { %2596 = shalt.err (!%p2593_p1)
}
  0xb2   :  { %97 = dma.hbm_to_vmem [thread:$0]  %s3211_s7, 1024, %s92_s28, [#allocation9], %s2748_s29, %s2748_s29, %s2749_s30  }
  0xb3   :  { %s2758_s22 = smov [#allocation13]   ;;  %s2759_s21 = smov [#allocation16]  }
  0xb4   :  { %s118_s0 = sshll.u32 %s2758_s22, 4  ;;  %s140_s19 = sshll.u32 %s2759_s21, 4  ;;  %s119_s0 = int_to_ptr.vmem [resolvable:$true] %s118_s0  ;;  %s141_s19 = int_to_ptr.vmem [resolvable:$true] %s140_s19 }
  0xb5   :  { %s2597_s3 = scalar_lea.hbm %s3214_s10, 16 }
  0xb6   :  { %p2598_p2 = scmp.ne.s32.totalorder %s3214_s10, %s2597_s3  ;;  %p2601_p3 = scmp.lt.u32.totalorder %s2597_s3, %s3214_s10 }
  0xb8   :  { %p2603_p4 = pnand %p2601_p3, %p2598_p2 }
  0xba   :  { %2606 = shalt.err (!%p2603_p4)
}
  0xbb   :  { %s2607_s7 = scalar_lea.vmem %s119_s0, 16  ;;  %s2611_s28 = scalar_lea.vmem %s119_s0, 32 }
  0xbc   :  { %p2608_p5 = scmp.ne.s32.totalorder %s119_s0, %s2607_s7  ;;  %p2612_p6 = scmp.lt.s32.totalorder %s119_s0, %s119_s0 }
  0xbd   :  { %p2613_p7 = scmp.lt.s32.totalorder %s2611_s28, %s2607_s7 }
  0xbf   :  { %p2614_p8 = por %p2613_p7, %p2612_p6 }
  0xc1   :  { %p2615_p9 = pnand %p2614_p8, %p2608_p5 }
  0xc3   :  { %2618 = shalt.err (!%p2615_p9)
}
  0xc4   :  { %121 = dma.hbm_to_vmem [thread:$0]  %s3214_s10, 16, %s119_s0, [#allocation12]  }
  0xc5   :  { %s2619_s23 = scalar_lea.hbm %s3216_s12, 16 }
  0xc6   :  { %p2620_p10 = scmp.ne.s32.totalorder %s3216_s12, %s2619_s23  ;;  %p2623_p11 = scmp.lt.u32.totalorder %s2619_s23, %s3216_s12 }
  0xc8   :  { %p2625_p12 = pnand %p2623_p11, %p2620_p10 }
  0xca   :  { %2628 = shalt.err (!%p2625_p12)
}
  0xcb   :  { %s2629_s21 = scalar_lea.vmem %s141_s19, 16  ;;  %s2633_s4 = scalar_lea.vmem %s141_s19, 32 }
  0xcc   :  { %p2630_p13 = scmp.ne.s32.totalorder %s141_s19, %s2629_s21  ;;  %p2634_p0 = scmp.lt.s32.totalorder %s141_s19, %s141_s19 }
  0xcd   :  { %p2635_p1 = scmp.lt.s32.totalorder %s2633_s4, %s2629_s21 }
  0xcf   :  { %p2636_p2 = por %p2635_p1, %p2634_p0 }
  0xd1   :  { %p2637_p3 = pnand %p2636_p2, %p2630_p13 }
  0xd3   :  { %2640 = shalt.err (!%p2637_p3)
}
  0xd4   :  { %143 = dma.hbm_to_vmem [thread:$0]  %s3216_s12, 16, %s141_s19, [#allocation15]  }
  0xd5   :  { %s2760_s20 = smov [#allocation19]   ;;  %s2761_s11 = smov [#allocation22]  }
  0xd6   :  { %s159_s3 = sshll.u32 %s2760_s20, 4  ;;  %s181_s24 = sshll.u32 %s2761_s11, 4  ;;  %s160_s3 = int_to_ptr.vmem [resolvable:$true] %s159_s3  ;;  %s182_s24 = int_to_ptr.vmem [resolvable:$true] %s181_s24 }
  0xd7   :  { %s2641_s7 = scalar_lea.hbm %s3218_s14, 1024 }
  0xd8   :  { %p2642_p4 = scmp.ne.s32.totalorder %s3218_s14, %s2641_s7  ;;  %p2645_p5 = scmp.lt.u32.totalorder %s2641_s7, %s3218_s14 }
  0xda   :  { %p2647_p6 = pnand %p2645_p5, %p2642_p4 }
  0xdc   :  { %2650 = shalt.err (!%p2647_p6)
}
  0xdd   :  { %s2651_s12 = scalar_lea.vmem %s160_s3, 1024  ;;  %p2656_p8 = scmp.lt.s32.totalorder %s160_s3, %s160_s3 }
  0xde   :  { %p2652_p7 = scmp.ne.s32.totalorder %s160_s3, %s2651_s12  ;;  %p2657_p9 = scmp.lt.s32.totalorder %s2651_s12, %s2651_s12 }
  0xe0   :  { %p2658_p10 = por %p2657_p9, %p2656_p8 }
  0xe2   :  { %p2659_p11 = pnand %p2658_p10, %p2652_p7 }
  0xe4   :  { %2662 = shalt.err (!%p2659_p11)
}
  0xe5   :  { %165 = dma.hbm_to_vmem [thread:$0]  %s3218_s14, 1024, %s160_s3, [#allocation18], %s2748_s29, %s2748_s29, %s2749_s30  }
  0xe6   :  { %s2663_s5 = scalar_lea.hbm %s3220_s16, 1024 }
  0xe7   :  { %p2664_p12 = scmp.ne.s32.totalorder %s3220_s16, %s2663_s5  ;;  %p2667_p13 = scmp.lt.u32.totalorder %s2663_s5, %s3220_s16 }
  0xe9   :  { %p2669_p0 = pnand %p2667_p13, %p2664_p12 }
  0xeb   :  { %2672 = shalt.err (!%p2669_p0)
}
  0xec   :  { %s2673_s10 = scalar_lea.vmem %s182_s24, 1024  ;;  %p2678_p2 = scmp.lt.s32.totalorder %s182_s24, %s182_s24 }
  0xed   :  { %p2674_p1 = scmp.ne.s32.totalorder %s182_s24, %s2673_s10  ;;  %p2679_p3 = scmp.lt.s32.totalorder %s2673_s10, %s2673_s10 }
  0xef   :  { %p2680_p4 = por %p2679_p3, %p2678_p2 }
  0xf1   :  { %p2681_p5 = pnand %p2680_p4, %p2674_p1 }
  0xf3   :  { %2684 = shalt.err (!%p2681_p5)
}
  0xf4   :  { %187 = dma.hbm_to_vmem [thread:$0]  %s3220_s16, 1024, %s182_s24, [#allocation21], %s2748_s29, %s2748_s29, %s2749_s30  }
  0xf5   :  { %s2762_s20 = smov [#allocation23]   ;;  %s2685_s25 = scalar_lea.hbm %s3221_s17, 16 }
  0xf6   :  { %s194_s3 = sshll.u32 %s2762_s20, 4  ;;  %p2686_p6 = scmp.ne.s32.totalorder %s3221_s17, %s2685_s25  ;;  %s195_s3 = int_to_ptr.vmem [resolvable:$true] %s194_s3 }
  0xf7   :  { %p2689_p7 = scmp.lt.u32.totalorder %s2685_s25, %s3221_s17 }
  0xf9   :  { %p2691_p8 = pnand %p2689_p7, %p2686_p6 }
  0xfb   :  { %2694 = shalt.err (!%p2691_p8)
}
  0xfc   :  { %s2695_s1 = scalar_lea.vmem %s195_s3, 16  ;;  %s2699_s16 = scalar_lea.vmem %s195_s3, 32 }
  0xfd   :  { %p2696_p9 = scmp.ne.s32.totalorder %s195_s3, %s2695_s1  ;;  %p2700_p10 = scmp.lt.s32.totalorder %s195_s3, %s195_s3 }
  0xfe   :  { %p2701_p11 = scmp.lt.s32.totalorder %s2699_s16, %s2695_s1 }
 0x100   :  { %p2702_p12 = por %p2701_p11, %p2700_p10 }
 0x102   :  { %p2703_p13 = pnand %p2702_p12, %p2696_p9 }
 0x104   :  { %2706 = shalt.err (!%p2703_p13)
}
 0x105   :  { %197 = dma.hbm_to_vmem [thread:$0]  %s3221_s17, 16, %s195_s3, [#allocation24]  }
 0x106   :  { %2729 = dma.done.wait [#allocation3], 896  }
 0x107   :  { %2730 = vsyncadd [#allocation3], 4294966400 }
 0x108   :  { %2731 = dma.done.wait [#allocation6], 8192  }
 0x109   :  { %2732 = vsyncadd [#allocation6], 4294959104 }
 0x10a   :  { %2733 = dma.done.wait [#allocation9], 2048  }
 0x10b   :  { %2734 = vsyncadd [#allocation9], 4294965248 }
 0x10c   :  { %2735 = dma.done.wait [#allocation12], 1040  }
 0x10d   :  { %2736 = vsyncadd [#allocation12], 4294966256 }
 0x10e   :  { %2737 = dma.done.wait [#allocation15], 1040  }
 0x10f   :  { %2738 = vsyncadd [#allocation15], 4294966256 }
 0x110   :  { %2739 = dma.done.wait [#allocation18], 1152  }
 0x111   :  { %2740 = vsyncadd [#allocation18], 4294966144 }
 0x112   :  { %2741 = dma.done.wait [#allocation21], 1040  }
 0x113   :  { %2742 = vsyncadd [#allocation21], 4294966256 }
 0x114   :  { %2743 = dma.done.wait [#allocation24], 16  }
 0x115   :  { %2744 = vsyncadd [#allocation24], 4294967280  ;;  %v2277_v0 = vld [vmem:[#allocation5 + $0x40] sm:$0xff]   ;;  %v2281_v4 = vld [vmem:[#allocation5 + $0x48] sm:$0xff]   ;;  %v2763_v43 = vmov 0.0   ;;  %vm2764_vm0 = vmmov 0  }
 0x116   :  { %v2278_v1 = vld [vmem:[#allocation5] sm:$0xff]   ;;  %1931 = vmatprep.subr.bf16.mxu0 %v2277_v0  ;;  %v2282_v5 = vld [vmem:[#allocation5 + $0x8] sm:$0xff]   ;;  %v2285_v8 = vld [vmem:[#allocation5 + $0x50] sm:$0xff]   ;;  %s3239_s12 = sld [smem:[#allocation37_spill]]  ;;  %s3240_s23 = sld [smem:[#allocation39_spill]] }
 0x117   :  { %v2279_v2 = vld [vmem:[#allocation5 + $0xc0] sm:$0xff]   ;;  %1932 = vmatpush3.bf16.msra.mxu0 %v2278_v1  ;;  %v2283_v6 = vld [vmem:[#allocation5 + $0xc8] sm:$0xff]   ;;  %v2286_v9 = vld [vmem:[#allocation5 + $0x10] sm:$0xff]   ;;  %s3241_s29 = sld [smem:[#allocation40_spill]]  ;;  %s2765_s30 = smov [#allocation25]  }
 0x118   :  { %v2280_v3 = vld [vmem:[#allocation5 + $0x80] sm:$0xff]   ;;  %1953 = vmatprep.subr.bf16.mxu1 %v2279_v2  ;;  %1933 = vmatprep.subr.bf16.mxu0 %v2281_v4  ;;  %v2284_v7 = vld [vmem:[#allocation5 + $0x88] sm:$0xff]   ;;  %v2287_v10 = vld [vmem:[#allocation5 + $0xd0] sm:$0xff]   ;;  %s1786_s17 = sshll.u32 %s2765_s30, 4  ;;  %s1787_s17 = int_to_ptr.vmem [resolvable:$true] %s1786_s17 }
 0x119   :  { %1954 = vmatpush3.bf16.msra.mxu1 %v2280_v3  ;;  %v2288_v11 = vld [vmem:[#allocation5 + $0x90] sm:$0xff]   ;;  %v2289_v12 = vld [vmem:[#allocation5 + $0x58] sm:$0xff]   ;;  %v2293_v16 = vld [vmem:[#allocation5 + $0x60] sm:$0xff]   ;;  %p2712_p1 = scmp.lt.s32.totalorder %s1787_s17, %s1787_s17 }
 0x11a   :  { %1955 = vmatprep.subr.bf16.mxu1 %v2283_v6  ;;  %v2290_v13 = vld [vmem:[#allocation5 + $0x18] sm:$0xff]   ;;  %v2294_v17 = vld [vmem:[#allocation5 + $0x20] sm:$0xff]   ;;  %v2297_v20 = vld [vmem:[#allocation5 + $0x68] sm:$0xff]  }
 0x11b   :  { %1934 = vmatpush3.bf16.msra.mxu0 %v2282_v5  ;;  %v2291_v14 = vld [vmem:[#allocation5 + $0xd8] sm:$0xff]   ;;  %v2295_v18 = vld [vmem:[#allocation5 + $0xe0] sm:$0xff]   ;;  %v2298_v21 = vld [vmem:[#allocation5 + $0x28] sm:$0xff]  }
 0x11c   :  { %1935 = vmatprep.subr.bf16.mxu0 %v2285_v8  ;;  %v2292_v15 = vld [vmem:[#allocation5 + $0x98] sm:$0xff]   ;;  %v2296_v19 = vld [vmem:[#allocation5 + $0xa0] sm:$0xff]   ;;  %v2299_v22 = vld [vmem:[#allocation5 + $0xe8] sm:$0xff]  }
 0x11d   :  { %1956 = vmatpush3.bf16.msra.mxu1 %v2284_v7  ;;  %v2300_v23 = vld [vmem:[#allocation5 + $0xa8] sm:$0xff]   ;;  %v2301_v24 = vld [vmem:[#allocation5 + $0x70] sm:$0xff]   ;;  %v2305_v28 = vld [vmem:[#allocation5 + $0x78] sm:$0xff]  }
 0x11e   :  { %1957 = vmatprep.subr.bf16.mxu1 %v2287_v10  ;;  %v2302_v25 = vld [vmem:[#allocation5 + $0x30] sm:$0xff]   ;;  %v2306_v29 = vld [vmem:[#allocation5 + $0x38] sm:$0xff]   ;;  %v245_v34 = vld [vmem:[#allocation2] sm:$0xff] }
 0x11f   :  { %1936 = vmatpush3.bf16.msra.mxu0 %v2286_v9  ;;  %v2303_v26 = vld [vmem:[#allocation5 + $0xf0] sm:$0xff]   ;;  %v2307_v30 = vld [vmem:[#allocation5 + $0xf8] sm:$0xff]   ;;  %v252_v35 = vpack.c.bf16 %v245_v34, %v245_v34  ;;  %v2309_v36 = vld [vmem:[#allocation5 + $0x140] sm:$0xff]  }
 0x120   :  { %1937 = vmatprep.subr.bf16.mxu0 %v2289_v12  ;;  %v2304_v27 = vld [vmem:[#allocation5 + $0xb0] sm:$0xff]   ;;  %v2308_v33 = vld [vmem:[#allocation5 + $0xb8] sm:$0xff]   ;;  %v248_v37 = vld [vmem:[#allocation2 + $0x18] sm:$0xff] }
 0x121   :  { %1958 = vmatpush3.bf16.msra.mxu1 %v2288_v11  ;;  %v246_v31 = vld [vmem:[#allocation2 + $0x8] sm:$0xff]  ;;  %v255_v38 = vpack.c.bf16 %v248_v37, %v248_v37  ;;  %v2310_v39 = vld [vmem:[#allocation5 + $0x100] sm:$0xff]   ;;  %v247_v40 = vld [vmem:[#allocation2 + $0x10] sm:$0xff] }
 0x122   :  { %1959 = vmatprep.subr.bf16.mxu1 %v2291_v14  ;;  %v253_v32 = vpack.c.bf16 %v246_v31, %v246_v31  ;;  %v254_v41 = vpack.c.bf16 %v247_v40, %v247_v40  ;;  %v2311_v42 = vld [vmem:[#allocation5 + $0x180] sm:$0xff]   ;;  %v2312_v44 = vld [vmem:[#allocation5 + $0x148] sm:$0xff]   ;;  %v2315_v47 = vld [vmem:[#allocation5 + $0x150] sm:$0xff]  }
 0x123   :  { %1938 = vmatpush3.bf16.msra.mxu0 %v2290_v13  ;;  %786 = vmatprep.mubr.bf16.mxu1 %v255_v38  ;;  %v2313_v45 = vld [vmem:[#allocation5 + $0x108] sm:$0xff]   ;;  %v2316_v48 = vld [vmem:[#allocation5 + $0x110] sm:$0xff]   ;;  %v2318_v50 = vld [vmem:[#allocation5 + $0x158] sm:$0xff]  }
 0x124   :  { %1939 = vmatprep.subr.bf16.mxu0 %v2293_v16  ;;  %746 = vmatprep.mubr.bf16.mxu0 %v253_v32  ;;  %v2314_v46 = vld [vmem:[#allocation5 + $0x188] sm:$0xff]   ;;  %v2317_v49 = vld [vmem:[#allocation5 + $0x190] sm:$0xff]   ;;  %v2319_v51 = vld [vmem:[#allocation5 + $0x118] sm:$0xff]  }
 0x125   :  { %1960 = vmatpush3.bf16.msra.mxu1 %v2292_v15  ;;  %v2321_v52 = vld [vmem:[#allocation5 + $0x160] sm:$0xff]   ;;  %v2320_v53 = vld [vmem:[#allocation5 + $0x198] sm:$0xff]   ;;  %v2324_v55 = vld [vmem:[#allocation5 + $0x168] sm:$0xff]  }
 0x126   :  { %1961 = vmatprep.subr.bf16.mxu1 %v2295_v18  ;;  %v2322_v54 = vld [vmem:[#allocation5 + $0x120] sm:$0xff]   ;;  %v2325_v57 = vld [vmem:[#allocation5 + $0x128] sm:$0xff]   ;;  %v2327_v58 = vld [vmem:[#allocation5 + $0x170] sm:$0xff]  }
 0x127   :  { %1940 = vmatpush3.bf16.msra.mxu0 %v2294_v17  ;;  %v2323_v56 = vld [vmem:[#allocation5 + $0x1a0] sm:$0xff]   ;;  %v2326_v59 = vld [vmem:[#allocation5 + $0x1a8] sm:$0xff]   ;;  %v2328_v60 = vld [vmem:[#allocation5 + $0x130] sm:$0xff]  }
 0x128   :  { %1941 = vmatprep.subr.bf16.mxu0 %v2297_v20  ;;  %v250_v61 = vld [vmem:[#allocation2 + $0x28] sm:$0xff]  ;;  %v2330_v63 = vld [vmem:[#allocation5 + $0x178] sm:$0xff]   ;;  %v249_v2 = vld [vmem:[#allocation2 + $0x20] sm:$0xff] }
 0x129   :  { %1962 = vmatpush3.bf16.msra.mxu1 %v2296_v19  ;;  %v2329_v62 = vld [vmem:[#allocation5 + $0x1b0] sm:$0xff]   ;;  %v257_v0 = vpack.c.bf16 %v250_v61, %v250_v61  ;;  %v2331_v1 = vld [vmem:[#allocation5 + $0x138] sm:$0xff]   ;;  %v256_v5 = vpack.c.bf16 %v249_v2, %v249_v2  ;;  %v2333_v7 = vld [vmem:[#allocation7] sm:$0xff]  }
 0x12a   :  { %1963 = vmatprep.subr.bf16.mxu1 %v2299_v22  ;;  %v2332_v3 = vld [vmem:[#allocation5 + $0x1b8] sm:$0xff]   ;;  %v2334_v8 = vld [vmem:[#allocation7 + $0x8] sm:$0xff]   ;;  %v2335_v9 = vld [vmem:[#allocation7 + $0x10] sm:$0xff]  }
 0x12b   :  { %1942 = vmatpush3.bf16.msra.mxu0 %v2298_v21  ;;  %v251_v4 = vld [vmem:[#allocation2 + $0x30] sm:$0xff]  ;;  %v2337_v11 = vld [vmem:[#allocation7 + $0x20] sm:$0xff]   ;;  %v2338_v12 = vld [vmem:[#allocation7 + $0x28] sm:$0xff]  }
 0x12c   :  { %1943 = vmatprep.subr.bf16.mxu0 %v2301_v24  ;;  %v258_v6 = vpack.c.bf16 %v251_v4, %v251_v4  ;;  %v2336_v10 = vld [vmem:[#allocation7 + $0x18] sm:$0xff]   ;;  %v2339_v13 = vld [vmem:[#allocation7 + $0x30] sm:$0xff]   ;;  %v2341_v15 = vld [vmem:[#allocation8] sm:$0xff]  }
 0x12d   :  { %1964 = vmatpush3.bf16.msra.mxu1 %v2300_v23  ;;  %v2340_v14 = vld [vmem:[#allocation7 + $0x38] sm:$0xff]   ;;  %v2342_v16 = vld [vmem:[#allocation8 + $0x8] sm:$0xff]   ;;  %v2343_v17 = vld [vmem:[#allocation8 + $0x10] sm:$0xff]  }
 0x12e   :  { %1965 = vmatprep.subr.bf16.mxu1 %v2303_v26  ;;  %v2344_v18 = vld [vmem:[#allocation8 + $0x18] sm:$0xff]   ;;  %v2345_v19 = vld [vmem:[#allocation8 + $0x20] sm:$0xff]   ;;  %v2346_v20 = vld [vmem:[#allocation8 + $0x28] sm:$0xff]  }
 0x12f   :  { %1944 = vmatpush3.bf16.msra.mxu0 %v2302_v25  ;;  %v1802_v22 = vld [vmem:[%s3239_s12] ss:$0 sm:$0xff]  ;;  %v2357_v2 = vld [vmem:[#allocation11] sm:$0xff]   ;;  %v2361_v4 = vld [vmem:[#allocation11 + $0x10] sm:$0xff]  }
 0x130   :  { %1945 = vmatprep.subr.bf16.mxu0 %v2305_v28 }
 0x131   :  { %1966 = vmatpush3.bf16.msra.mxu1 %v2304_v27 }
 0x132   :  { %1967 = vmatprep.subr.bf16.mxu1 %v2307_v30 }
 0x133   :  { %1946 = vmatpush3.bf16.msra.mxu0 %v2306_v29 }
 0x134   :  { %1975 = vmatprep.subr.bf16.mxu0 %v2309_v36 }
 0x135   :  { %1968 = vmatpush3.bf16.msra.mxu1 %v2308_v33 }
 0x136   :  { %747 = vmatmul.mubr.bf16.vlgmr.msra.gmra.mrb[0].mxu0 %v252_v35  ;;  %2078 = vmatprep.subr.bf16.mxu1 %v2763_v43 }
 0x137   :  { %1976 = vmatpush3.bf16.msra.mxu0 %v2310_v39  ;;  %826 = vmatprep.mubr.bf16.mxu0 %v257_v0 }
 0x138   :  { %787 = vmatmul.mubr.bf16.vlgmr.msra.gmra.mrb[0].mxu1 %v254_v41  ;;  %1977 = vmatprep.subr.bf16.mxu0 %v2312_v44 }
 0x139   :  { %2079 = vmatpush3.bf16.msra.mxu1 %v2311_v42  ;;  %2094 = vmatprep.mubr.msk.bf16.mxu1 %vm2764_vm0, %v2763_v43 }
 0x13a   :  { %2080 = vmatprep.subr.bf16.mxu1 %v2763_v43 }
 0x13b   :  { %1978 = vmatpush3.bf16.msra.mxu0 %v2313_v45 }
 0x13c   :  { %1979 = vmatprep.subr.bf16.mxu0 %v2315_v47 }
 0x13d   :  { %2081 = vmatpush3.bf16.msra.mxu1 %v2314_v46 }
 0x13e   :  { %2082 = vmatprep.subr.bf16.mxu1 %v2763_v43 }
 0x13f   :  { %1980 = vmatpush3.bf16.msra.mxu0 %v2316_v48  ;;  %v2347_v48 = vld [vmem:[#allocation8 + $0x30] sm:$0xff]  }
 0x140   :  { %1981 = vmatprep.subr.bf16.mxu0 %v2318_v50  ;;  %v2349_v50 = vld [vmem:[#allocation10] sm:$0xff]  }
 0x141   :  { %2083 = vmatpush3.bf16.msra.mxu1 %v2317_v49  ;;  %v2348_v49 = vld [vmem:[#allocation8 + $0x38] sm:$0xff]  }
 0x142   :  { %2084 = vmatprep.subr.bf16.mxu1 %v2763_v43 }
 0x143   :  { %1982 = vmatpush3.bf16.msra.mxu0 %v2319_v51  ;;  %v2350_v51 = vld [vmem:[#allocation10 + $0x8] sm:$0xff]  }
 0x144   :  { %1983 = vmatprep.subr.bf16.mxu0 %v2321_v52  ;;  %v2351_v52 = vld [vmem:[#allocation10 + $0x10] sm:$0xff]  }
 0x145   :  { %2085 = vmatpush3.bf16.msra.mxu1 %v2320_v53  ;;  %v2352_v53 = vld [vmem:[#allocation10 + $0x18] sm:$0xff]  }
 0x146   :  { %2086 = vmatprep.subr.bf16.mxu1 %v2763_v43 }
 0x147   :  { %1984 = vmatpush3.bf16.msra.mxu0 %v2322_v54  ;;  %v2353_v54 = vld [vmem:[#allocation10 + $0x20] sm:$0xff]  }
 0x148   :  { %1985 = vmatprep.subr.bf16.mxu0 %v2324_v55  ;;  %v2354_v55 = vld [vmem:[#allocation10 + $0x28] sm:$0xff]  }
 0x149   :  { %2087 = vmatpush3.bf16.msra.mxu1 %v2323_v56  ;;  %v2355_v56 = vld [vmem:[#allocation10 + $0x30] sm:$0xff]  }
 0x14a   :  { %2088 = vmatprep.subr.bf16.mxu1 %v2763_v43 }
 0x14b   :  { %1986 = vmatpush3.bf16.msra.mxu0 %v2325_v57  ;;  %v1859_v57 = vld [vmem:[%s3240_s23] ss:$0 sm:$0xff] }
 0x14c   :  { %1987 = vmatprep.subr.bf16.mxu0 %v2327_v58 }
 0x14d   :  { %2089 = vmatpush3.bf16.msra.mxu1 %v2326_v59 }
 0x14e   :  { %2090 = vmatprep.subr.bf16.mxu1 %v2763_v43 }
 0x14f   :  { %1988 = vmatpush3.bf16.msra.mxu0 %v2328_v60 }
 0x150   :  { %1989 = vmatprep.subr.bf16.mxu0 %v2330_v63 }
 0x151   :  { %2091 = vmatpush3.bf16.msra.mxu1 %v2329_v62 }
 0x152   :  { %2092 = vmatprep.subr.bf16.mxu1 %v2763_v43 }
 0x153   :  { %1990 = vmatpush3.bf16.msra.mxu0 %v2331_v1  ;;  %v2356_v1 = vld [vmem:[#allocation10 + $0x38] sm:$0xff]  }
 0x154   :  { %2098 = vmatprep.subr.bf16.mxu0 %v2763_v43 }
 0x155   :  { %2093 = vmatpush3.bf16.msra.mxu1 %v2332_v3  ;;  %v2359_v3 = vld [vmem:[#allocation11 + $0x8] sm:$0xff]  }
 0x156   :  { %827 = vmatmul.mubr.bf16.vlgmr.msra.gmra.mrb[4].mxu0 %v256_v5  ;;  %2118 = vmatprep.subr.bf16.mxu1 %v2763_v43  ;;  %v2363_v5 = vld [vmem:[#allocation11 + $0x18] sm:$0xff]  }
 0x157   :  { %2114 = vmatprep.mubr.msk.bf16.mxu0 %vm2764_vm0, %v2763_v43  ;;  %2099 = vmatpush3.bf16.msra.mxu0 %v2333_v7  ;;  %v2367_v7 = vld [vmem:[#allocation11 + $0x28] sm:$0xff]  }
 0x158   :  { %2095 = vmatmul.mubr.bf16.vlgmr.msra.gmra.mrb[4].mxu1 %v258_v6  ;;  %2100 = vmatprep.subr.bf16.mxu0 %v2763_v43  ;;  %v2365_v6 = vld [vmem:[#allocation11 + $0x20] sm:$0xff]  }
 0x159   :  { %2134 = vmatprep.mubr.msk.bf16.mxu1 %vm2764_vm0, %v2763_v43  ;;  %2119 = vmatpush3.bf16.msra.mxu1 %v2341_v15 }
 0x15a   :  { %2120 = vmatprep.subr.bf16.mxu1 %v2763_v43 }
 0x15b   :  { %2101 = vmatpush3.bf16.msra.mxu0 %v2334_v8  ;;  %v1868_v8 = vld [vmem:[%s3210_s6] ss:$0 sm:$0xff] }
 0x15c   :  { %2102 = vmatprep.subr.bf16.mxu0 %v2763_v43 }
 0x15d   :  { %2121 = vmatpush3.bf16.msra.mxu1 %v2342_v16  ;;  %v2360_v16 = vld [vmem:[#allocation14 + $0x8] sm:$0xff]  }
 0x15e   :  { %2122 = vmatprep.subr.bf16.mxu1 %v2763_v43 }
 0x15f   :  { %2103 = vmatpush3.bf16.msra.mxu0 %v2335_v9 }
 0x160   :  { %2104 = vmatprep.subr.bf16.mxu0 %v2763_v43 }
 0x161   :  { %2123 = vmatpush3.bf16.msra.mxu1 %v2343_v17  ;;  %v2362_v17 = vld [vmem:[#allocation14 + $0x10] sm:$0xff]  }
 0x162   :  { %2124 = vmatprep.subr.bf16.mxu1 %v2763_v43 }
 0x163   :  { %2105 = vmatpush3.bf16.msra.mxu0 %v2336_v10 }
 0x164   :  { %2106 = vmatprep.subr.bf16.mxu0 %v2763_v43 }
 0x165   :  { %2125 = vmatpush3.bf16.msra.mxu1 %v2344_v18  ;;  %v2364_v18 = vld [vmem:[#allocation14 + $0x18] sm:$0xff]  }
 0x166   :  { %2126 = vmatprep.subr.bf16.mxu1 %v2763_v43 }
 0x167   :  { %2107 = vmatpush3.bf16.msra.mxu0 %v2337_v11 }
 0x168   :  { %2108 = vmatprep.subr.bf16.mxu0 %v2763_v43 }
 0x169   :  { %2127 = vmatpush3.bf16.msra.mxu1 %v2345_v19  ;;  %v2366_v19 = vld [vmem:[#allocation14 + $0x20] sm:$0xff]  }
 0x16a   :  { %2128 = vmatprep.subr.bf16.mxu1 %v2763_v43 }
 0x16b   :  { %2109 = vmatpush3.bf16.msra.mxu0 %v2338_v12 }
 0x16c   :  { %2110 = vmatprep.subr.bf16.mxu0 %v2763_v43 }
 0x16d   :  { %2129 = vmatpush3.bf16.msra.mxu1 %v2346_v20  ;;  %v2368_v20 = vld [vmem:[#allocation14 + $0x28] sm:$0xff]  }
 0x16e   :  { %2130 = vmatprep.subr.bf16.mxu1 %v2763_v43 }
 0x16f   :  { %2111 = vmatpush3.bf16.msra.mxu0 %v2339_v13  ;;  %v2358_v13 = vld [vmem:[#allocation14] sm:$0xff]  }
 0x170   :  { %2112 = vmatprep.subr.bf16.mxu0 %v2763_v43 }
 0x171   :  { %2131 = vmatpush3.bf16.msra.mxu1 %v2347_v48  ;;  %v1895_v48 = vld [vmem:[#allocation16] ss:$0 sm:$0xff] }
 0x172   :  { %2132 = vmatprep.subr.bf16.mxu1 %v2763_v43 }
 0x173   :  { %2113 = vmatpush3.bf16.msra.mxu0 %v2340_v14 }
 0x174   :  { %2138 = vmatprep.subr.bf16.mxu0 %v2763_v43 }
 0x175   :  { %2133 = vmatpush3.bf16.msra.mxu1 %v2348_v49 }
 0x176   :  { %2158 = vmatprep.subr.bf16.mxu1 %v2763_v43 }
 0x209   :  { %v1947_v21 = vpop.f32.mrb[0].mxu0 }
 0x20a   :  { %v1948_v23 = vpop.f32.mrb[1].mxu0 }
 0x20b   :  { %v1949_v24 = vadd.f32 %v1948_v23, %v1947_v21  ;;  %v1950_v25 = vpop.f32.mrb[2].mxu0  ;;  %v1969_v26 = vpop.f32.mrb[0].mxu1  ;;  %v2369_v21 = vld [vmem:[#allocation11 + $0x30] sm:$0xff]   ;;  %v2371_v23 = vld [vmem:[#allocation11 + $0x38] sm:$0xff]  }
 0x20c   :  { %v1951_v27 = vpop.f32.mrb[3].mxu0  ;;  %v1970_v29 = vpop.f32.mrb[1].mxu1  ;;  %v1877_v25 = vld [vmem:[%s3212_s8] ss:$0 sm:$0xff] }
 0x20d   :  { %v749_v28 = vadd.f32 %v1949_v24, %v1802_v22  ;;  %v1971_v30 = vadd.f32 %v1970_v29, %v1969_v26  ;;  %v1972_v31 = vpop.f32.mrb[2].mxu1  ;;  %v2370_v22 = vld [vmem:[#allocation14 + $0x30] sm:$0xff]   ;;  %v2372_v24 = vld [vmem:[#allocation14 + $0x38] sm:$0xff]  }
 0x20e   :  { %v1973_v32 = vpop.f32.mrb[3].mxu1 }
 0x20f   :  { %v789_v33 = vadd.f32 %v1971_v30, %v749_v28  ;;  %v2373_v32 = vld [vmem:[#allocation19] sm:$0xff]  }
 0x229   :  { %v1991_v34 = vpop.f32.mrb[4].mxu0 }
 0x22a   :  { %v1992_v35 = vpop.f32.mrb[5].mxu0 }
 0x22b   :  { %v1993_v36 = vadd.f32 %v1992_v35, %v1991_v34  ;;  %v1994_v37 = vpop.f32.mrb[6].mxu0  ;;  %v868_v38 = vpop.f32.mrb[4].mxu1  ;;  %v2374_v34 = vld [vmem:[#allocation19 + $0x8] sm:$0xff]   ;;  %v2375_v35 = vld [vmem:[#allocation19 + $0x10] sm:$0xff]  }
 0x22c   :  { %v1995_v39 = vpop.f32.mrb[7].mxu0  ;;  %v2096_v41 = vpop.f32.mrb[5].mxu1  ;;  %v2377_v37 = vld [vmem:[#allocation19 + $0x20] sm:$0xff]  }
 0x22d   :  { %v829_v40 = vadd.f32 %v1993_v36, %v789_v33  ;;  %v871_v42 = vpop.f32.mrb[6].mxu1  ;;  %v2376_v36 = vld [vmem:[#allocation19 + $0x18] sm:$0xff]   ;;  %v2379_v39 = vld [vmem:[#allocation19 + $0x30] sm:$0xff]   ;;  %v2381_v41 = vld [vmem:[#allocation22] sm:$0xff]  }
 0x22e   :  { %v2097_v45 = vpop.f32.mrb[7].mxu1  ;;  %v2382_v42 = vld [vmem:[#allocation22 + $0x8] sm:$0xff]  }
 0x22f   :  { %v869_v44 = vadd.f32 %v868_v38, %v829_v40  ;;  %v2378_v38 = vld [vmem:[#allocation19 + $0x28] sm:$0xff]   ;;  %v2380_v40 = vld [vmem:[#allocation19 + $0x38] sm:$0xff]  }
 0x230   :  { %v2384_v45 = vld [vmem:[#allocation22 + $0x18] sm:$0xff]  }
 0x231   :  { %v874_v46 = vmax.f32 %v869_v44, 0.0  ;;  %v2383_v44 = vld [vmem:[#allocation22 + $0x10] sm:$0xff]  }
 0x233   :  { %v875_v47 = vpack.c.bf16 %v874_v46, %v874_v46  ;;  %v2385_v46 = vld [vmem:[#allocation22 + $0x20] sm:$0xff]  }
 0x235   :  { %2115 = vmatmul.mubr.bf16.vlgmr.msra.gmra.mrb[8].mxu0 %v875_v47  ;;  %v2386_v47 = vld [vmem:[#allocation22 + $0x28] sm:$0xff]  }
 0x236   :  { %2154 = vmatprep.mubr.msk.bf16.mxu0 %vm2764_vm0, %v2763_v43  ;;  %2139 = vmatpush3.bf16.msra.mxu0 %v2349_v50 }
 0x237   :  { %2140 = vmatprep.subr.bf16.mxu0 %v2763_v43 }
 0x23a   :  { %2141 = vmatpush3.bf16.msra.mxu0 %v2350_v51 }
 0x23b   :  { %2142 = vmatprep.subr.bf16.mxu0 %v2763_v43 }
 0x23e   :  { %2143 = vmatpush3.bf16.msra.mxu0 %v2351_v52 }
 0x23f   :  { %2144 = vmatprep.subr.bf16.mxu0 %v2763_v43 }
 0x242   :  { %2145 = vmatpush3.bf16.msra.mxu0 %v2352_v53 }
 0x243   :  { %2146 = vmatprep.subr.bf16.mxu0 %v2763_v43 }
 0x246   :  { %2147 = vmatpush3.bf16.msra.mxu0 %v2353_v54 }
 0x247   :  { %2148 = vmatprep.subr.bf16.mxu0 %v2763_v43 }
 0x24a   :  { %2149 = vmatpush3.bf16.msra.mxu0 %v2354_v55 }
 0x24b   :  { %2150 = vmatprep.subr.bf16.mxu0 %v2763_v43 }
 0x24e   :  { %2151 = vmatpush3.bf16.msra.mxu0 %v2355_v56 }
 0x24f   :  { %2152 = vmatprep.subr.bf16.mxu0 %v2763_v43 }
 0x252   :  { %2153 = vmatpush3.bf16.msra.mxu0 %v2356_v1 }
 0x253   :  { %2178 = vmatprep.subr.bf16.mxu0 %v2763_v43 }
 0x308   :  { %v981_v58 = vpop.f32.mrb[8].mxu0 }
 0x309   :  { %v982_v59 = vadd.f32 %v1859_v57, %v981_v58  ;;  %v2116_v60 = vpop.f32.mrb[9].mxu0 }
 0x30a   :  { %v984_v61 = vpop.f32.mrb[10].mxu0  ;;  %v1886_v60 = vld [vmem:[#allocation13] ss:$0 sm:$0xff] }
 0x30b   :  { %v987_v62 = vmax.f32 %v982_v59, 0.0  ;;  %v2117_v63 = vpop.f32.mrb[11].mxu0  ;;  %v1439_v61 = vld [vmem:[#allocation17] sm:$0xff] }
 0x30d   :  { %v988_v0 = vpack.c.bf16 %v987_v62, %v987_v62 }
 0x30f   :  { %2135 = vmatmul.mubr.bf16.vlgmr.msra.gmra.mrb[8].mxu1 %v988_v0 }
 0x310   :  { %2174 = vmatprep.mubr.msk.bf16.mxu1 %vm2764_vm0, %v2763_v43  ;;  %2159 = vmatpush3.bf16.msra.mxu1 %v2357_v2 }
 0x311   :  { %2160 = vmatprep.subr.bf16.mxu1 %v2763_v43 }
 0x314   :  { %2161 = vmatpush3.bf16.msra.mxu1 %v2359_v3  ;;  %v2387_v3 = vld [vmem:[#allocation22 + $0x30] sm:$0xff]  }
 0x315   :  { %2162 = vmatprep.subr.bf16.mxu1 %v2763_v43 }
 0x318   :  { %2163 = vmatpush3.bf16.msra.mxu1 %v2361_v4  ;;  %v2388_v4 = vld [vmem:[#allocation22 + $0x38] sm:$0xff]  }
 0x319   :  { %2164 = vmatprep.subr.bf16.mxu1 %v2763_v43 }
 0x31c   :  { %2165 = vmatpush3.bf16.msra.mxu1 %v2363_v5  ;;  %v2389_v5 = vld [vmem:[%s3222_s18] sm:$0xff]  }
 0x31d   :  { %2166 = vmatprep.subr.bf16.mxu1 %v2763_v43 }
 0x320   :  { %2167 = vmatpush3.bf16.msra.mxu1 %v2365_v6  ;;  %v2390_v6 = vld [vmem:[%s3222_s18 + $0x8] sm:$0xff]  }
 0x321   :  { %2168 = vmatprep.subr.bf16.mxu1 %v2763_v43 }
 0x324   :  { %2169 = vmatpush3.bf16.msra.mxu1 %v2367_v7  ;;  %v2391_v7 = vld [vmem:[%s3222_s18 + $0x10] sm:$0xff]  }
 0x325   :  { %2170 = vmatprep.subr.bf16.mxu1 %v2763_v43 }
 0x328   :  { %2171 = vmatpush3.bf16.msra.mxu1 %v2369_v21  ;;  %v1913_v21 = vld [vmem:[#allocation23] ss:$0 sm:$0xff] }
 0x329   :  { %2172 = vmatprep.subr.bf16.mxu1 %v2763_v43 }
 0x32c   :  { %2173 = vmatpush3.bf16.msra.mxu1 %v2371_v23 }
 0x32d   :  { %2198 = vmatprep.subr.bf16.mxu1 %v2763_v43 }
 0x3e2   :  { %v1094_v9 = vpop.f32.mrb[8].mxu1 }
 0x3e3   :  { %v1095_v10 = vadd.f32 %v1868_v8, %v1094_v9  ;;  %v2136_v11 = vpop.f32.mrb[9].mxu1  ;;  %v2392_v8 = vld [vmem:[%s3222_s18 + $0x18] sm:$0xff]   ;;  %v2393_v9 = vld [vmem:[%s3222_s18 + $0x20] sm:$0xff]  }
 0x3e4   :  { %v1097_v12 = vpop.f32.mrb[10].mxu1  ;;  %v2395_v11 = vld [vmem:[%s3222_s18 + $0x30] sm:$0xff]  }
 0x3e5   :  { %v1100_v14 = vpack.c.bf16 %v1095_v10, %v1095_v10  ;;  %v2137_v15 = vpop.f32.mrb[11].mxu1  ;;  %v2394_v10 = vld [vmem:[%s3222_s18 + $0x28] sm:$0xff]   ;;  %v1904_v12 = vld [vmem:[#allocation20] ss:$0 sm:$0xff] }
 0x3e7   :  { %2155 = vmatmul.mubr.bf16.vlgmr.msra.gmra.mrb[12].mxu0 %v1100_v14 }
 0x3e8   :  { %2179 = vmatpush3.bf16.msra.mxu0 %v2358_v13  ;;  %2194 = vmatprep.mubr.msk.bf16.mxu0 %vm2764_vm0, %v2763_v43 }
 0x3e9   :  { %2180 = vmatprep.subr.bf16.mxu0 %v2763_v43 }
 0x3ec   :  { %2181 = vmatpush3.bf16.msra.mxu0 %v2360_v16 }
 0x3ed   :  { %2182 = vmatprep.subr.bf16.mxu0 %v2763_v43 }
 0x3f0   :  { %2183 = vmatpush3.bf16.msra.mxu0 %v2362_v17 }
 0x3f1   :  { %2184 = vmatprep.subr.bf16.mxu0 %v2763_v43 }
 0x3f4   :  { %2185 = vmatpush3.bf16.msra.mxu0 %v2364_v18 }
 0x3f5   :  { %2186 = vmatprep.subr.bf16.mxu0 %v2763_v43 }
 0x3f8   :  { %2187 = vmatpush3.bf16.msra.mxu0 %v2366_v19 }
 0x3f9   :  { %2188 = vmatprep.subr.bf16.mxu0 %v2763_v43 }
 0x3fc   :  { %2189 = vmatpush3.bf16.msra.mxu0 %v2368_v20  ;;  %v2396_v20 = vld [vmem:[%s3222_s18 + $0x38] sm:$0xff]   ;;  %s2707_s18 = scalar_lea.vmem %s1787_s17, 128 }
 0x3fd   :  { %2190 = vmatprep.subr.bf16.mxu0 %v2763_v43  ;;  %p2708_p0 = scmp.ne.s32.totalorder %s1787_s17, %s2707_s18  ;;  %p2713_p2 = scmp.lt.s32.totalorder %s2707_s18, %s2707_s18 }
 0x3ff   :  { %p2714_p3 = por %p2713_p2, %p2712_p1 }
 0x400   :  { %2191 = vmatpush3.bf16.msra.mxu0 %v2370_v22 }
 0x401   :  { %2192 = vmatprep.subr.bf16.mxu0 %v2763_v43  ;;  %p2715_p4 = pnand %p2714_p3, %p2708_p0 }
 0x404   :  { %2193 = vmatpush3.bf16.msra.mxu0 %v2372_v24 }
 0x405   :  { %2218 = vmatprep.subr.bf16.mxu0 %v2763_v43 }
 0x4ba   :  { %v1206_v26 = vpop.f32.mrb[12].mxu0 }
 0x4bb   :  { %v1207_v27 = vadd.f32 %v1877_v25, %v1206_v26  ;;  %v2156_v28 = vpop.f32.mrb[13].mxu0 }
 0x4bc   :  { %v1209_v29 = vpop.f32.mrb[14].mxu0 }
 0x4bd   :  { %v1212_v30 = vmax.f32 %v1207_v27, 0.0  ;;  %v2157_v31 = vpop.f32.mrb[15].mxu0  ;;  %v1922_v27 = vld [vmem:[%s3241_s29] ss:$0 sm:$0xff] }
 0x4bf   :  { %v1213_v33 = vpack.c.bf16 %v1212_v30, %v1212_v30 }
 0x4c1   :  { %2175 = vmatmul.mubr.bf16.vlgmr.msra.gmra.mrb[12].mxu1 %v1213_v33  ;;  %2195 = vmatmul.mubr.bf16.vlgmr.msra.gmra.mrb[16].mxu0 %v1213_v33 }
 0x4c2   :  { %2199 = vmatpush3.bf16.msra.mxu1 %v2373_v32  ;;  %2214 = vmatprep.mubr.msk.bf16.mxu1 %vm2764_vm0, %v2763_v43 }
 0x4c3   :  { %2200 = vmatprep.subr.bf16.mxu1 %v2763_v43  ;;  %2234 = vmatprep.mubr.msk.bf16.mxu0 %vm2764_vm0, %v2763_v43 }
 0x4c4   :  { %2219 = vmatpush3.bf16.msra.mxu0 %v2381_v41 }
 0x4c5   :  { %2220 = vmatprep.subr.bf16.mxu0 %v2763_v43 }
 0x4c6   :  { %2201 = vmatpush3.bf16.msra.mxu1 %v2374_v34 }
 0x4c7   :  { %2202 = vmatprep.subr.bf16.mxu1 %v2763_v43 }
 0x4c8   :  { %2221 = vmatpush3.bf16.msra.mxu0 %v2382_v42 }
 0x4c9   :  { %2222 = vmatprep.subr.bf16.mxu0 %v2763_v43 }
 0x4ca   :  { %2203 = vmatpush3.bf16.msra.mxu1 %v2375_v35 }
 0x4cb   :  { %2204 = vmatprep.subr.bf16.mxu1 %v2763_v43 }
 0x4cc   :  { %2223 = vmatpush3.bf16.msra.mxu0 %v2383_v44 }
 0x4cd   :  { %2224 = vmatprep.subr.bf16.mxu0 %v2763_v43 }
 0x4ce   :  { %2205 = vmatpush3.bf16.msra.mxu1 %v2376_v36 }
 0x4cf   :  { %2206 = vmatprep.subr.bf16.mxu1 %v2763_v43 }
 0x4d0   :  { %2225 = vmatpush3.bf16.msra.mxu0 %v2384_v45 }
 0x4d1   :  { %2226 = vmatprep.subr.bf16.mxu0 %v2763_v43 }
 0x4d2   :  { %2207 = vmatpush3.bf16.msra.mxu1 %v2377_v37 }
 0x4d3   :  { %2208 = vmatprep.subr.bf16.mxu1 %v2763_v43 }
 0x4d4   :  { %2227 = vmatpush3.bf16.msra.mxu0 %v2385_v46 }
 0x4d5   :  { %2228 = vmatprep.subr.bf16.mxu0 %v2763_v43 }
 0x4d6   :  { %2209 = vmatpush3.bf16.msra.mxu1 %v2378_v38 }
 0x4d7   :  { %2210 = vmatprep.subr.bf16.mxu1 %v2763_v43 }
 0x4d8   :  { %2229 = vmatpush3.bf16.msra.mxu0 %v2386_v47 }
 0x4d9   :  { %2230 = vmatprep.subr.bf16.mxu0 %v2763_v43 }
 0x4da   :  { %2211 = vmatpush3.bf16.msra.mxu1 %v2379_v39 }
 0x4db   :  { %2212 = vmatprep.subr.bf16.mxu1 %v2763_v43 }
 0x4dc   :  { %2231 = vmatpush3.bf16.msra.mxu0 %v2387_v3 }
 0x4dd   :  { %2232 = vmatprep.subr.bf16.mxu0 %v2763_v43 }
 0x4de   :  { %2213 = vmatpush3.bf16.msra.mxu1 %v2380_v40 }
 0x4df   :  { %2238 = vmatprep.subr.bf16.mxu1 %v2763_v43 }
 0x4e0   :  { %2233 = vmatpush3.bf16.msra.mxu0 %v2388_v4 }
 0x594   :  { %v1319_v49 = vpop.f32.mrb[12].mxu1  ;;  %v1430_v50 = vpop.f32.mrb[16].mxu0 }
 0x595   :  { %v1431_v51 = vadd.f32 %v1895_v48, %v1430_v50  ;;  %v2176_v52 = vpop.f32.mrb[13].mxu1  ;;  %v2196_v53 = vpop.f32.mrb[17].mxu0  ;;  %v1320_v63 = vadd.f32 %v1886_v60, %v1319_v49 }
 0x596   :  { %v1322_v54 = vpop.f32.mrb[14].mxu1  ;;  %v1433_v55 = vpop.f32.mrb[18].mxu0 }
 0x597   :  { %v1436_v56 = vmul.f32 0.5, %v1431_v51  ;;  %v2177_v57 = vpop.f32.mrb[15].mxu1  ;;  %v2197_v58 = vpop.f32.mrb[19].mxu0 }
 0x599   :  { %v1437_v59 = vmul.f32 1.442695, %v1436_v56 }
 0x59b   :  { %2397 = vpow2.f32 %v1437_v59 }
 0x5a5   :  { %v2398_v62 = vpop.eup %2397 }
 0x5a6   :  { %v1440_v0 = vmul.f32 %v2398_v62, %v1439_v61 }
 0x5a8   :  { %v1441_v1 = vadd.f32 %v1440_v0, %v1320_v63 }
 0x5aa   :  { %v1442_v2 = vpack.c.bf16 %v1441_v1, %v1441_v1 }
 0x5ac   :  { %2215 = vmatmul.mubr.bf16.vlgmr.msra.gmra.mrb[16].mxu1 %v1442_v2 }
 0x5ad   :  { %2254 = vmatprep.mubr.msk.bf16.mxu1 %vm2764_vm0, %v2763_v43  ;;  %2239 = vmatpush3.bf16.msra.mxu1 %v2389_v5 }
 0x5ae   :  { %2240 = vmatprep.subr.bf16.mxu1 %v2763_v43 }
 0x5b1   :  { %2241 = vmatpush3.bf16.msra.mxu1 %v2390_v6 }
 0x5b2   :  { %2242 = vmatprep.subr.bf16.mxu1 %v2763_v43 }
 0x5b5   :  { %2243 = vmatpush3.bf16.msra.mxu1 %v2391_v7 }
 0x5b6   :  { %2244 = vmatprep.subr.bf16.mxu1 %v2763_v43 }
 0x5b9   :  { %2245 = vmatpush3.bf16.msra.mxu1 %v2392_v8 }
 0x5ba   :  { %2246 = vmatprep.subr.bf16.mxu1 %v2763_v43 }
 0x5bd   :  { %2247 = vmatpush3.bf16.msra.mxu1 %v2393_v9 }
 0x5be   :  { %2248 = vmatprep.subr.bf16.mxu1 %v2763_v43 }
 0x5c1   :  { %2249 = vmatpush3.bf16.msra.mxu1 %v2394_v10 }
 0x5c2   :  { %2250 = vmatprep.subr.bf16.mxu1 %v2763_v43 }
 0x5c5   :  { %2251 = vmatpush3.bf16.msra.mxu1 %v2395_v11 }
 0x5c6   :  { %2252 = vmatprep.subr.bf16.mxu1 %v2763_v43 }
 0x5c9   :  { %2253 = vmatpush3.bf16.msra.mxu1 %v2396_v20 }
 0x67f   :  { %v1548_v13 = vpop.f32.mrb[16].mxu1 }
 0x680   :  { %v1549_v14 = vadd.f32 %v1904_v12, %v1548_v13  ;;  %v2216_v15 = vpop.f32.mrb[17].mxu1 }
 0x681   :  { %v1551_v16 = vpop.f32.mrb[18].mxu1 }
 0x682   :  { %v1554_v17 = vmax.f32 %v1549_v14, 0.0  ;;  %v2217_v18 = vpop.f32.mrb[19].mxu1 }
 0x684   :  { %v1555_v19 = vpack.c.bf16 %v1554_v17, %v1554_v17 }
 0x686   :  { %2235 = vmatmul.mubr.bf16.vlgmr.msra.gmra.mrb[20].mxu0 %v1555_v19 }
 0x759   :  { %v1661_v22 = vpop.f32.mrb[20].mxu0 }
 0x75a   :  { %v1662_v23 = vadd.f32 %v1913_v21, %v1661_v22  ;;  %v2236_v24 = vpop.f32.mrb[21].mxu0 }
 0x75b   :  { %v1664_v25 = vpop.f32.mrb[22].mxu0 }
 0x75c   :  { %v1667_v43 = vpack.c.bf16 %v1662_v23, %v1662_v23  ;;  %v2237_v26 = vpop.f32.mrb[23].mxu0 }
 0x75e   :  { %2255 = vmatmul.mubr.bf16.vlgmr.msra.gmra.mrb[20].mxu1 %v1667_v43 }
 0x831   :  { %v1773_v28 = vpop.f32.mrb[20].mxu1 }
 0x832   :  { %v1774_v29 = vadd.f32 %v1922_v27, %v1773_v28  ;;  %v2256_v30 = vpop.f32.mrb[21].mxu1 }
 0x833   :  { %v1776_v31 = vpop.f32.mrb[22].mxu1 }
 0x834   :  { %1779 = vst [vmem:[#allocation25] sm:$0xff] %v1774_v29  ;;  %v2257_v32 = vpop.f32.mrb[23].mxu1 }
 0x835   :  { %2718 = shalt.err (!%p2715_p4)
}
 0x836   :  { %s3242_s19 = sld [smem:[#allocation41_spill]] }
 0x83c   :  { %s2719_s27 = scalar_lea.hbm %s3242_s19, 128 }
 0x83d   :  { %p2720_p5 = scmp.ne.s32.totalorder %s3242_s19, %s2719_s27  ;;  %p2723_p6 = scmp.lt.u32.totalorder %s2719_s27, %s3242_s19 }
 0x83f   :  { %p2725_p7 = pnand %p2723_p6, %p2720_p5 }
 0x841   :  { %2728 = shalt.err (!%p2725_p7)
}
 0x842   :  { %1789 = dma.vmem_to_hbm [thread:$0]  %s1787_s17, 128, %s3242_s19, [#allocation4]  }
 0x843   :  { %2745 = dma.done.wait [#allocation4], 128  }
 0x844   :  { %2746 = vsyncadd [#allocation4], 4294967168 }
 0x845   :  { %1793 = vsyncpa [#allocation3], 1 }
 0x846   :  { %1794 = vsyncpa [#allocation6], 1 }
 0x847   :  { %1795 = vsyncpa [#allocation9], 1 }
 0x848   :  { %1796 = vsyncpa [#allocation12], 1 }
 0x849   :  { %1797 = vsyncpa [#allocation15], 1 }
 0x84a   :  { %1798 = vsyncpa [#allocation18], 1 }
 0x84b   :  { %1799 = vsyncpa [#allocation21], 1 }
 0x84c   :  { %1800 = vsyncpa [#allocation24], 1 }
 0x84d   :  { %1801 = vsyncpa [#allocation4], 1 }

</bundles_post_ra>
